<compile_context>
chip_gen: v7x
topology: tpu7x:2x2x1
jax: 0.10.0
libtpu: 0.0.40
codegen_flags: <defaults>
</compile_context>

<pallas_src>
import functools
import math

import jax
import jax.numpy as jnp
from jax.experimental import pallas as pl
from jax.experimental.pallas import tpu as pltpu


def multi_heads_kernel(x_ref, w_ref, o_ref, *, heads, inv_t):
    """x_ref: (tm, D) compute dtype; w_ref: (heads, D, P) resident; o_ref: (heads, tm, P)."""
    x = x_ref[...]                                              # (tm, D), bf16 (or f32)
    for h in range(heads):                                      # static unroll (heads is small)
        # no-bias linear for head h: MXU matmul with f32 accumulation
        s = jnp.dot(x, w_ref[h], preferred_element_type=jnp.float32)   # (tm, P) f32
        if inv_t != 1.0:
            s = s * inv_t
        # numerically-stable softmax over the class (last / lane) dim, all in f32
        s = s - jnp.max(s, axis=-1, keepdims=True)
        e = jnp.exp(s)
        denom = jnp.sum(e, axis=-1, keepdims=True)
        p = e * pl.reciprocal(denom, approx=True)               # EUP reciprocal (free slot)
        o_ref[h] = p.astype(o_ref.dtype)


def multi_heads_forward(x, w_stack, *, temperature=0.0, row_tile=256,
                        compute_dtype=jnp.bfloat16):
    """Multi-head classifier scores.

    x:        (B, N, D)   input tokens.
    w_stack:  (heads, P, D)  per-head nn.Linear weights in PyTorch (out, in) layout, no bias.
    returns:  (B, heads*N, P) == torch.cat([softmax(x @ W_h.T / t, -1) for h], dim=1)
    """
    B, N, D = x.shape
    heads, P, D2 = w_stack.shape
    assert D2 == D, "weight in_features must match input feature dim"
    out_dtype = x.dtype

    M = B * N
    tm = int(row_tile)
    num_tiles = pl.cdiv(M, tm)
    M_pad = num_tiles * tm

    xf = x.reshape(M, D)
    if M_pad != M:
        # pad token rows with zeros; padded rows produce a harmless uniform softmax
        # and are sliced off below (no NaNs, no divisibility assert needed).
        xf = jnp.pad(xf, ((0, M_pad - M), (0, 0)))
    xf = xf.astype(compute_dtype)

    # (heads, D, P): each head's matmul is x(tm,D) @ w_h(D,P); bf16 for MXU rate.
    wt = jnp.swapaxes(w_stack, 1, 2).astype(compute_dtype)

    inv_t = (1.0 / float(temperature)) if temperature != 0.0 else 1.0
    kernel = functools.partial(multi_heads_kernel, heads=heads, inv_t=inv_t)

    out = pl.pallas_call(
        kernel,
        out_shape=jax.ShapeDtypeStruct((heads, M_pad, P), out_dtype),
        grid_spec=pltpu.PrefetchScalarGridSpec(
            num_scalar_prefetch=0,
            grid=(num_tiles,),
            in_specs=[
                # token-row tile, streamed over the grid
                pl.BlockSpec((tm, D), lambda i: (i, 0)),
                # full stacked weights, constant block index -> DMA'd once, VMEM-resident
                pl.BlockSpec((heads, D, P), lambda i: (0, 0, 0)),
            ],
            out_specs=pl.BlockSpec((heads, tm, P), lambda i: (0, i, 0)),
        ),
        compiler_params=pltpu.CompilerParams(
            dimension_semantics=("parallel",),
        ),
    )(xf, wt)

    out = out[:, :M, :]                                         # (heads, M, P)
    out = out.reshape(heads, B, N, P)
    out = jnp.transpose(out, (1, 0, 2, 3))                      # (B, heads, N, P)
    return out.reshape(B, heads * N, P)                         # matches torch.cat(dim=1)


if __name__ == "__main__":
    key = jax.random.PRNGKey(0)
    kx, kw = jax.random.split(key)

    # Small shapes consistent with the module (inplanes=D, planes=P, heads).
    B, N, D, P, heads = 2, 70, 256, 128, 4      # M = 140 -> padded to 256 (2 row tiles)

    x = jax.random.normal(kx, (B, N, D), jnp.float32)
    # kaiming_normal_(a=0, mode='fan_out') on a (P, D) Linear weight: std = sqrt(2 / P)
    w_stack = jax.random.normal(kw, (heads, P, D), jnp.float32) * math.sqrt(2.0 / P)

    out = multi_heads_forward(x, w_stack, temperature=0.0, row_tile=128)
    out = jax.block_until_ready(out)

    # Reference (plain JAX) with the same bf16-rounded operands, f32 math.
    xc = x.astype(jnp.bfloat16).astype(jnp.float32)
    wc = w_stack.astype(jnp.bfloat16).astype(jnp.float32)
    logits = jnp.einsum("bnd,hpd->bhnp", xc, wc)                # (B, heads, N, P)
    ref = jax.nn.softmax(logits, axis=-1).reshape(B, heads * N, P)

    assert out.shape == (B, heads * N, P)
    assert bool(jnp.isfinite(out).all())
    assert jnp.allclose(out, ref, atol=2e-3, rtol=0), float(jnp.max(jnp.abs(out - ref)))

    print("KERNEL_OK")
</pallas_src>

<mosaic_0001>
module attributes {stable_mosaic.version = 11 : i64} {
  func.func @multi_heads_kernel(%arg0: i32, %arg1: memref<128x256xbf16, #tpu.memory_space<vmem>>, %arg2: memref<4x256x128xbf16, #tpu.memory_space<vmem>>, %arg3: memref<4x128x128xf32, #tpu.memory_space<vmem>>) attributes {dimension_semantics = [#tpu.dimension_semantics<parallel>], iteration_bounds = array<i64: 2>, scalar_prefetch = 0 : i64, scratch_operands = 0 : i64, tpu.core_type = #tpu.core_type<tc>, window_params = [{transform_indices = @transform_0, window_bounds = array<i64: 128, 256>}, {pipeline_mode = #tpu.pipeline_mode<synchronous>, transform_indices = @transform_1, window_bounds = array<i64: 4, 256, 128>}, {transform_indices = @transform_2, window_bounds = array<i64: 4, 128, 128>}]} {
    %c0 = arith.constant 0 : index
    %c0_0 = arith.constant 0 : index
    %0 = vector.load %arg1[%c0, %c0_0] : memref<128x256xbf16, #tpu.memory_space<vmem>>, vector<128x256xbf16>
    %c0_1 = arith.constant 0 : index
    %c0_2 = arith.constant 0 : index
    %c0_3 = arith.constant 0 : index
    %1 = vector.load %arg2[%c0_1, %c0_2, %c0_3] : memref<4x256x128xbf16, #tpu.memory_space<vmem>>, vector<1x256x128xbf16>
    %2 = vector.shape_cast %1 : vector<1x256x128xbf16> to vector<256x128xbf16>
    %cst = arith.constant dense<0.000000e+00> : vector<128x128xf32>
    %3 = tpu.matmul %0, %2, %cst {dimension_numbers = #tpu.dot_dimension_numbers<[1], [0], [0], [1], [0, 0, 1, 1], [], []>} : vector<128x256xbf16>, vector<256x128xbf16>, vector<128x128xf32> -> vector<128x128xf32>
    %cst_4 = arith.constant dense<0xFF800000> : vector<128xf32>
    %4 = vector.multi_reduction <maximumf>, %3, %cst_4 [1] : vector<128x128xf32> to vector<128xf32>
    %5 = vector.shape_cast %4 : vector<128xf32> to vector<128x1xf32>
    %6 = vector.broadcast %5 : vector<128x1xf32> to vector<128x128xf32>
    %7 = arith.subf %3, %6 : vector<128x128xf32>
    %8 = math.exp %7 : vector<128x128xf32>
    %cst_5 = arith.constant dense<0.000000e+00> : vector<128xf32>
    %9 = vector.multi_reduction <add>, %8, %cst_5 [1] : vector<128x128xf32> to vector<128xf32>
    %10 = vector.shape_cast %9 : vector<128xf32> to vector<128x1xf32>
    %11 = tpu.reciprocal %10 {approx = true} : vector<128x1xf32> -> vector<128x1xf32>
    %12 = vector.broadcast %11 : vector<128x1xf32> to vector<128x128xf32>
    %13 = arith.mulf %8, %12 : vector<128x128xf32>
    %c0_6 = arith.constant 0 : index
    %c0_7 = arith.constant 0 : index
    %c0_8 = arith.constant 0 : index
    %14 = vector.load %arg3[%c0_6, %c0_7, %c0_8] : memref<4x128x128xf32, #tpu.memory_space<vmem>>, vector<1x128x128xf32>
    %15 = vector.shape_cast %14 : vector<1x128x128xf32> to vector<128x128xf32>
    %16 = vector.shape_cast %13 : vector<128x128xf32> to vector<1x128x128xf32>
    tpu.vector_store %arg3[%c0_6, %c0_7, %c0_8], %16 {strides = array<i32>} : memref<4x128x128xf32, #tpu.memory_space<vmem>>, vector<1x128x128xf32>,
    %c1 = arith.constant 1 : index
    %c0_9 = arith.constant 0 : index
    %c0_10 = arith.constant 0 : index
    %17 = vector.load %arg2[%c1, %c0_9, %c0_10] : memref<4x256x128xbf16, #tpu.memory_space<vmem>>, vector<1x256x128xbf16>
    %18 = vector.shape_cast %17 : vector<1x256x128xbf16> to vector<256x128xbf16>
    %cst_11 = arith.constant dense<0.000000e+00> : vector<128x128xf32>
    %19 = tpu.matmul %0, %18, %cst_11 {dimension_numbers = #tpu.dot_dimension_numbers<[1], [0], [0], [1], [0, 0, 1, 1], [], []>} : vector<128x256xbf16>, vector<256x128xbf16>, vector<128x128xf32> -> vector<128x128xf32>
    %cst_12 = arith.constant dense<0xFF800000> : vector<128xf32>
    %20 = vector.multi_reduction <maximumf>, %19, %cst_12 [1] : vector<128x128xf32> to vector<128xf32>
    %21 = vector.shape_cast %20 : vector<128xf32> to vector<128x1xf32>
    %22 = vector.broadcast %21 : vector<128x1xf32> to vector<128x128xf32>
    %23 = arith.subf %19, %22 : vector<128x128xf32>
    %24 = math.exp %23 : vector<128x128xf32>
    %cst_13 = arith.constant dense<0.000000e+00> : vector<128xf32>
    %25 = vector.multi_reduction <add>, %24, %cst_13 [1] : vector<128x128xf32> to vector<128xf32>
    %26 = vector.shape_cast %25 : vector<128xf32> to vector<128x1xf32>
    %27 = tpu.reciprocal %26 {approx = true} : vector<128x1xf32> -> vector<128x1xf32>
    %28 = vector.broadcast %27 : vector<128x1xf32> to vector<128x128xf32>
    %29 = arith.mulf %24, %28 : vector<128x128xf32>
    %c1_14 = arith.constant 1 : index
    %c0_15 = arith.constant 0 : index
    %c0_16 = arith.constant 0 : index
    %30 = vector.load %arg3[%c1_14, %c0_15, %c0_16] : memref<4x128x128xf32, #tpu.memory_space<vmem>>, vector<1x128x128xf32>
    %31 = vector.shape_cast %30 : vector<1x128x128xf32> to vector<128x128xf32>
    %32 = vector.shape_cast %29 : vector<128x128xf32> to vector<1x128x128xf32>
    tpu.vector_store %arg3[%c1_14, %c0_15, %c0_16], %32 {strides = array<i32>} : memref<4x128x128xf32, #tpu.memory_space<vmem>>, vector<1x128x128xf32>,
    %c2 = arith.constant 2 : index
    %c0_17 = arith.constant 0 : index
    %c0_18 = arith.constant 0 : index
    %33 = vector.load %arg2[%c2, %c0_17, %c0_18] : memref<4x256x128xbf16, #tpu.memory_space<vmem>>, vector<1x256x128xbf16>
    %34 = vector.shape_cast %33 : vector<1x256x128xbf16> to vector<256x128xbf16>
    %cst_19 = arith.constant dense<0.000000e+00> : vector<128x128xf32>
    %35 = tpu.matmul %0, %34, %cst_19 {dimension_numbers = #tpu.dot_dimension_numbers<[1], [0], [0], [1], [0, 0, 1, 1], [], []>} : vector<128x256xbf16>, vector<256x128xbf16>, vector<128x128xf32> -> vector<128x128xf32>
    %cst_20 = arith.constant dense<0xFF800000> : vector<128xf32>
    %36 = vector.multi_reduction <maximumf>, %35, %cst_20 [1] : vector<128x128xf32> to vector<128xf32>
    %37 = vector.shape_cast %36 : vector<128xf32> to vector<128x1xf32>
    %38 = vector.broadcast %37 : vector<128x1xf32> to vector<128x128xf32>
    %39 = arith.subf %35, %38 : vector<128x128xf32>
    %40 = math.exp %39 : vector<128x128xf32>
    %cst_21 = arith.constant dense<0.000000e+00> : vector<128xf32>
    %41 = vector.multi_reduction <add>, %40, %cst_21 [1] : vector<128x128xf32> to vector<128xf32>
    %42 = vector.shape_cast %41 : vector<128xf32> to vector<128x1xf32>
    %43 = tpu.reciprocal %42 {approx = true} : vector<128x1xf32> -> vector<128x1xf32>
    %44 = vector.broadcast %43 : vector<128x1xf32> to vector<128x128xf32>
    %45 = arith.mulf %40, %44 : vector<128x128xf32>
    %c2_22 = arith.constant 2 : index
    %c0_23 = arith.constant 0 : index
    %c0_24 = arith.constant 0 : index
    %46 = vector.load %arg3[%c2_22, %c0_23, %c0_24] : memref<4x128x128xf32, #tpu.memory_space<vmem>>, vector<1x128x128xf32>
    %47 = vector.shape_cast %46 : vector<1x128x128xf32> to vector<128x128xf32>
    %48 = vector.shape_cast %45 : vector<128x128xf32> to vector<1x128x128xf32>
    tpu.vector_store %arg3[%c2_22, %c0_23, %c0_24], %48 {strides = array<i32>} : memref<4x128x128xf32, #tpu.memory_space<vmem>>, vector<1x128x128xf32>,
    %c3 = arith.constant 3 : index
    %c0_25 = arith.constant 0 : index
    %c0_26 = arith.constant 0 : index
    %49 = vector.load %arg2[%c3, %c0_25, %c0_26] : memref<4x256x128xbf16, #tpu.memory_space<vmem>>, vector<1x256x128xbf16>
    %50 = vector.shape_cast %49 : vector<1x256x128xbf16> to vector<256x128xbf16>
    %cst_27 = arith.constant dense<0.000000e+00> : vector<128x128xf32>
    %51 = tpu.matmul %0, %50, %cst_27 {dimension_numbers = #tpu.dot_dimension_numbers<[1], [0], [0], [1], [0, 0, 1, 1], [], []>} : vector<128x256xbf16>, vector<256x128xbf16>, vector<128x128xf32> -> vector<128x128xf32>
    %cst_28 = arith.constant dense<0xFF800000> : vector<128xf32>
    %52 = vector.multi_reduction <maximumf>, %51, %cst_28 [1] : vector<128x128xf32> to vector<128xf32>
    %53 = vector.shape_cast %52 : vector<128xf32> to vector<128x1xf32>
    %54 = vector.broadcast %53 : vector<128x1xf32> to vector<128x128xf32>
    %55 = arith.subf %51, %54 : vector<128x128xf32>
    %56 = math.exp %55 : vector<128x128xf32>
    %cst_29 = arith.constant dense<0.000000e+00> : vector<128xf32>
    %57 = vector.multi_reduction <add>, %56, %cst_29 [1] : vector<128x128xf32> to vector<128xf32>
    %58 = vector.shape_cast %57 : vector<128xf32> to vector<128x1xf32>
    %59 = tpu.reciprocal %58 {approx = true} : vector<128x1xf32> -> vector<128x1xf32>
    %60 = vector.broadcast %59 : vector<128x1xf32> to vector<128x128xf32>
    %61 = arith.mulf %56, %60 : vector<128x128xf32>
    %c3_30 = arith.constant 3 : index
    %c0_31 = arith.constant 0 : index
    %c0_32 = arith.constant 0 : index
    %62 = vector.load %arg3[%c3_30, %c0_31, %c0_32] : memref<4x128x128xf32, #tpu.memory_space<vmem>>, vector<1x128x128xf32>
    %63 = vector.shape_cast %62 : vector<1x128x128xf32> to vector<128x128xf32>
    %64 = vector.shape_cast %61 : vector<128x128xf32> to vector<1x128x128xf32>
    tpu.vector_store %arg3[%c3_30, %c0_31, %c0_32], %64 {strides = array<i32>} : memref<4x128x128xf32, #tpu.memory_space<vmem>>, vector<1x128x128xf32>,
    return
  }
  func.func @transform_0(%arg0: i32) -> (i32, i32) {
    %c0_i32 = arith.constant 0 : i32
    %c0_i32_0 = arith.constant 0 : i32
    return %arg0, %c0_i32 : i32, i32
  }
  func.func @transform_1(%arg0: i32) -> (i32, i32, i32) {
    %c0_i32 = arith.constant 0 : i32
    %c0_i32_0 = arith.constant 0 : i32
    %c0_i32_1 = arith.constant 0 : i32
    %c0_i32_2 = arith.constant 0 : i32
    return %c0_i32, %c0_i32_0, %c0_i32_1 : i32, i32, i32
  }
  func.func @transform_2(%arg0: i32) -> (i32, i32, i32) {
    %c0_i32 = arith.constant 0 : i32
    %c0_i32_0 = arith.constant 0 : i32
    %c0_i32_1 = arith.constant 0 : i32
    return %c0_i32, %arg0, %c0_i32_0 : i32, i32, i32
  }
}

</mosaic_0001>

<bundles_post_ra>
// kernel: tpu_custom_call.1
= control target key start
LH: loop header
LB: loop body
LE: loop exit
PB: predicated region body
PF: predicated region fallthrough
CT: control target
= control target key end

     0   :  { %7 = vsyncpa [#allocation3], 0  ;;  %s3741_s0 = inlined_call_operand.hbm [shape: bf16[256,256], index: 0, kind: input, shape index: {}]   ;;  %s3742_s1 = inlined_call_operand.hbm [shape: bf16[4,256,128], index: 1, kind: input, shape index: {}]   ;;  %s3743_s2 = inlined_call_operand.hbm [shape: f32[4,256,128], index: 2, kind: output, shape index: {}]  }
   0x1   :  { %9 = vsyncpa [#allocation3 + $0x1], 0 }
   0x2   :  { %10 = vsyncpa [#allocation6], 0 }
   0x3   :  { %11 = vsyncpa [#allocation4], 0 }
   0x4   :  { %13 = vsyncpa [#allocation4 + $0x1], 0  ;;  %s2901_s9 = smov 0   ;;  %s2903_s10 = smov 0  }
   0x5   :  { %s2905_s11 = smov 0   ;;  %s2907_s12 = smov 0  }
   0x6 LB: > { %s2922_s13 = sadd.s32 4294967295, %s2871_s12   ;;  %s1949_s14 = sadd.s32 4294967294, %s2871_s12   ;;  %s2871_s12 = sphi %s2907_s12, %s3838_s12   ;;  %s2867_s11 = sphi %s2905_s11, %s3837_s11   ;;  %s2863_s10 = sphi %s2903_s10, %s3836_s10   ;;  %s2859_s9 = sphi %s2901_s9, %s3835_s9  }
   0x7   : > { %p39_p0 = scmp.ne.s32.totalorder %s2863_s10, %s2859_s9  ;;  %p3744_p1 = scmp.eq.s32.totalorder %s2922_s13, 0 }
   0x8   : > { %p90_p3 = scmp.eq.s32.totalorder %s1949_s14, 1  ;;  %p1950_p5 = scmp.ge.s32.totalorder %s2871_s12, 1 }
   0x9   : > { %p2931_p4 = por %p3744_p1, %p39_p0  ;;  %p97_p7 = scmp.lt.s32.totalorder %s2871_s12, 3 }
   0xa   : > { %p2936_p6 = por %p90_p3, %p39_p0  ;;  %s2873_s18 = smov [#allocation5]  }
   0xb   : > { %s3772_s15 = scalar_select %p2931_p4, 1, 0 }
   0xc   : > { %s3773_s16 = scalar_select %p2936_p6, 1, 0 }
   0xd   : > { %p2941_p8 = pnand %p1950_p5, %p97_p7  ;;  %s109_s19 = sshll.u32 %s2873_s18, 4  ;;  %s2945_s19 = int_to_ptr.vmem [resolvable:$true] %s109_s19 }
   0xe   : > { %s2957_s21 = sadd.s32 1, %s2871_s12   ;;  %s26_s22 = sadd.s32 1, %s2867_s11 }
   0xf   : > { %s3774_s17 = scalar_select %p2941_p8, 1, 0 }
  0x10   : > { %p2367_p9 = pneg %p2941_p8  ;;  %s23_s23 = ssub.s32 %s2871_s12, %s2957_s21 }
  0x11   : > { %s2771_s26 = scalar_lea.hbm %s3742_s1, 8192 }
  0x12   : > { %p2952_p11 = pnand %p2367_p9, %p3744_p1  ;;  %p2772_p12 = scmp.ne.s32.totalorder %s3742_s1, %s2771_s26 }
  0x13   : > { %p2778_p5 = scmp.lt.u32.totalorder %s2771_s26, %s3742_s1 }
  0x14   : > { %p2773_p13 = pneg %p2952_p11 }
  0x16   : > { %p2774_p0 = pnand %p2773_p13, %p2772_p12 }
  0x18   : > { %p2775_p3 = pneg %p2774_p0 }
  0x1a   : > { %p2780_p7 = pnand %p2778_p5, %p2775_p3 }
  0x1c   : > { %2783 = shalt.err (!%p2780_p7)
}
  0x1d   : > { %s2784_s3 = scalar_lea.vmem %s2945_s19, 8192  ;;  %p2792_p2 = scmp.lt.s32.totalorder %s2945_s19, %s2945_s19 }
  0x1e   : > { %p2785_p9 = scmp.ne.s32.totalorder %s2945_s19, %s2784_s3  ;;  %p2793_p6 = scmp.lt.s32.totalorder %s2784_s3, %s2784_s3 }
  0x20   : > { %p2787_p10 = pnand %p2785_p9, %p2773_p13  ;;  %p2794_p4 = por %p2793_p6, %p2792_p2 }
  0x22   : > { %p2788_p1 = pneg %p2787_p10 }
  0x24   : > { %p2795_p8 = pnand %p2794_p4, %p2788_p1 }
  0x26   : > { %2798 = shalt.err (!%p2795_p8)
}
  0x27   : > { %s2874_s4 = smov 64   ;;  %s2875_s5 = smov 4  }
  0x28   : > { %2370 = dma.hbm_to_vmem [thread:$0]  (!%p2952_p11), %s3742_s1, 8192, %s2945_s19, [#allocation6], %s2874_s4, %s2874_s4, %s2875_s5  }
  0x29   : > { %p24_p2 = scmp.eq.s32.totalorder %s23_s23, 0  ;;  %p33_p1 = scmp.ne.s32.totalorder %s2867_s11, %s2863_s10 }
  0x2a   : > { %p34_p4 = scmp.eq.s32.totalorder %s2871_s12, 0  ;;  %p2380_p6 = scmp.lt.s32.totalorder %s2871_s12, 2 }
  0x2b   : > { %s2988_s8 = scalar_select %p24_p2, %s2867_s11, %s26_s22  }
  0x2c   : > { %p35_p8 = por %p34_p4, %p33_p1  ;;  %p3776_p10 = scmp.eq.s32.totalorder %s2922_s13, 1 }
  0x2d   : > { %s123_s18 = sand.u32 1, %s2867_s11   ;;  %s2095_s24 = sshll.u32 %s2871_s12, 11 }
  0x2e   : > { %p2992_p12 = por %p3776_p10, %p33_p1  ;;  %s1953_s25 = sshll.u32 %s123_s18, 7 }
  0x2f   : > { %s3001_s27 = scalar_lea.hbm %s3741_s0, %s2095_s24  ;;  %s127_s19 = scalar_lea.vmem [#allocation2], %s1953_s25 }
  0x30   : > { %s135_s22 = sshll.u32 %s127_s19, 4  ;;  %p3003_p11 = pnand %p2380_p6, %p35_p8  ;;  %s3007_s22 = int_to_ptr.vmem [resolvable:$true] %s135_s22 }
  0x31   : > { %s3009_s28 = scalar_lea.sflag [#allocation3], %s123_s18  ;;  %s2799_s29 = scalar_lea.hbm %s3001_s27, 2048 }
  0x32   : > { %p2800_p13 = scmp.ne.s32.totalorder %s3001_s27, %s2799_s29  ;;  %p2801_p0 = pneg %p3003_p11 }
  0x33   : > { %s2804_s4 = scalar_lea.hbm %s3741_s0, 4096  ;;  %p2805_p7 = scmp.lt.u32.totalorder %s3001_s27, %s3741_s0 }
  0x34   : > { %p2802_p3 = pnand %p2801_p0, %p2800_p13  ;;  %p2806_p9 = scmp.lt.u32.totalorder %s2804_s4, %s2799_s29 }
  0x35   : > { %p2808_p1 = scmp.lt.u32.totalorder %s2799_s29, %s3001_s27 }
  0x36   : > { %p2803_p5 = pneg %p2802_p3  ;;  %p2807_p2 = por %p2806_p9, %p2805_p7 }
  0x38   : > { %p2809_p4 = por %p2808_p1, %p2807_p2 }
  0x3a   : > { %p2810_p6 = pnand %p2809_p4, %p2803_p5 }
  0x3c   : > { %2813 = shalt.err (!%p2810_p6)
}
  0x3d   : > { %s2814_s7 = scalar_lea.vmem %s3007_s22, 2048  ;;  %s2876_s18 = smov [#allocation2]  }
  0x3e   : > { %p2815_p8 = scmp.ne.s32.totalorder %s3007_s22, %s2814_s7  ;;  %s2819_s24 = sshll.u32 %s2876_s18, 4  ;;  %s2820_s24 = int_to_ptr.vmem [resolvable:$false] %s2819_s24 }
  0x3f   : > { %s2821_s25 = scalar_lea.vmem %s2820_s24, 4096  ;;  %p2822_p3 = scmp.lt.s32.totalorder %s3007_s22, %s2820_s24 }
  0x40   : > { %p2817_p10 = pnand %p2815_p8, %p2801_p0  ;;  %p2823_p7 = scmp.lt.s32.totalorder %s2821_s25, %s2814_s7 }
  0x42   : > { %p2818_p13 = pneg %p2817_p10  ;;  %p2824_p9 = por %p2823_p7, %p2822_p3 }
  0x44   : > { %p2825_p2 = pnand %p2824_p9, %p2818_p13 }
  0x46   : > { %2828 = shalt.err (!%p2825_p2)
}
  0x47   : > { %s2877_s20 = smov 128   ;;  %s2878_s26 = smov 8  }
  0x48   : > { %2374 = dma.hbm_to_vmem [thread:$0]  (!%p3003_p11), %s3001_s27, 2048, %s3007_s22, %s3009_s28, %s2877_s20, %s2877_s20, %s2878_s26  }
  0x49   : > { %p3779_p0 = scmp.ne.s32.totalorder %s3774_s17, 0 }
  0x4b   : > { %147 = sbr.rel (%p3779_p0) target bundleno = 793 (0x319), region = 28 }
  0x52   : > { %s3040_s19 = sand.u32 1, %s2863_s10   ;;  %p3780_p5 = scmp.ne.s32.totalorder %s3772_s15, 0 }
  0x53   : > { %s1958_s29 = sshll.u32 %s3040_s19, 7  ;;  %s150_s30 = scalar_lea.sflag [#allocation3], %s3040_s19 }
  0x54   : > { %s3044_s3 = scalar_lea.vmem [#allocation2], %s1958_s29 }
  0x55   : > { %2846 = dma.done.wait (%p3780_p5), %s150_s30, 2048  }
  0x56   : > { %2848 = vsyncadd (%p3780_p5), %s150_s30, 4294965248  ;;  %p3781_p11 = scmp.eq.s32.totalorder %s2922_s13, 0 }
  0x58   : > { %2850 = dma.done.wait (%p3781_p11), [#allocation6], 8192   ;;  %p3782_p1 = pmov %p3781_p11 }
  0x59   : > { %v2427_v0 = vld [vmem:[#allocation5 + $0x40] sm:$0xff]   ;;  %v2431_v4 = vld [vmem:[#allocation5 + $0x48] sm:$0xff]   ;;  %v2435_v8 = vld [vmem:[#allocation5 + $0x50] sm:$0xff]   ;;  %s1960_s15 = sshll.u32 %s3040_s19, 9  ;;  %s1824_s27 = scalar_lea.sflag [#allocation4], %s3040_s19 }
  0x5a   : > { %2852 = vsyncadd (%p3782_p1), [#allocation6], 4294959104  ;;  %v2428_v1 = vld [vmem:[#allocation5 + $0xc0] sm:$0xff]   ;;  %2097 = vmatprep.subr.bf16.mxu0 %v2427_v0  ;;  %v2432_v5 = vld [vmem:[#allocation5 + $0xc8] sm:$0xff]   ;;  %s3574_s17 = scalar_lea.vmem [#allocation7], %s1960_s15 }
  0x5b   : > { %v2429_v2 = vld [vmem:[#allocation5] sm:$0xff]   ;;  %2161 = vmatprep.subr.bf16.mxu1 %v2428_v1  ;;  %v2433_v6 = vld [vmem:[#allocation5 + $0x8] sm:$0xff]   ;;  %v2436_v9 = vld [vmem:[#allocation5 + $0xd0] sm:$0xff]  }
  0x5c   : > { %v2430_v3 = vld [vmem:[#allocation5 + $0x80] sm:$0xff]   ;;  %2098 = vmatpush3.bf16.msra.mxu0 %v2429_v2  ;;  %v2434_v7 = vld [vmem:[#allocation5 + $0x88] sm:$0xff]   ;;  %v2437_v10 = vld [vmem:[#allocation5 + $0x10] sm:$0xff]  }
  0x5d   : > { %2162 = vmatpush3.bf16.msra.mxu1 %v2430_v3  ;;  %2099 = vmatprep.subr.bf16.mxu0 %v2431_v4  ;;  %v2438_v11 = vld [vmem:[#allocation5 + $0x90] sm:$0xff]   ;;  %v2439_v12 = vld [vmem:[#allocation5 + $0x58] sm:$0xff]   ;;  %v2443_v16 = vld [vmem:[#allocation5 + $0x60] sm:$0xff]  }
  0x5e   : > { %2163 = vmatprep.subr.bf16.mxu1 %v2432_v5  ;;  %v2440_v13 = vld [vmem:[#allocation5 + $0xd8] sm:$0xff]   ;;  %v2444_v17 = vld [vmem:[#allocation5 + $0xe0] sm:$0xff]   ;;  %v2447_v20 = vld [vmem:[#allocation5 + $0x68] sm:$0xff]  }
  0x5f   : > { %v2441_v14 = vld [vmem:[#allocation5 + $0x18] sm:$0xff]   ;;  %v2445_v18 = vld [vmem:[#allocation5 + $0x20] sm:$0xff]   ;;  %v2448_v21 = vld [vmem:[#allocation5 + $0xe8] sm:$0xff]  }
  0x60   : > { %2100 = vmatpush3.bf16.msra.mxu0 %v2433_v6  ;;  %v2442_v15 = vld [vmem:[#allocation5 + $0x98] sm:$0xff]   ;;  %v2446_v19 = vld [vmem:[#allocation5 + $0xa0] sm:$0xff]   ;;  %v2449_v22 = vld [vmem:[#allocation5 + $0x28] sm:$0xff]  }
  0x61   : > { %2164 = vmatpush3.bf16.msra.mxu1 %v2434_v7  ;;  %2101 = vmatprep.subr.bf16.mxu0 %v2435_v8  ;;  %v2450_v23 = vld [vmem:[#allocation5 + $0xa8] sm:$0xff]   ;;  %v2451_v24 = vld [vmem:[#allocation5 + $0x70] sm:$0xff]   ;;  %v2455_v28 = vld [vmem:[#allocation5 + $0x78] sm:$0xff]  }
  0x62   : > { %2165 = vmatprep.subr.bf16.mxu1 %v2436_v9  ;;  %v2452_v25 = vld [vmem:[#allocation5 + $0xf0] sm:$0xff]   ;;  %v2456_v29 = vld [vmem:[#allocation5 + $0xf8] sm:$0xff]   ;;  %v3055_v32 = vld [vmem:[%s3044_s3 + $0x4] ss:$8 sps:$4 sm:$0xff]  }
  0x63   : > { %v2453_v26 = vld [vmem:[#allocation5 + $0x30] sm:$0xff]   ;;  %v2457_v30 = vld [vmem:[#allocation5 + $0x38] sm:$0xff]   ;;  %v3058_v33 = vld [vmem:[%s3044_s3] ss:$8 sps:$4 sm:$0xff]   ;;  %437 = vmatprep.mubr.bf16.mxu0 %v3055_v32  ;;  %823 = vmatprep.mubr.bf16.mxu1 %v3055_v32 }
  0x64   : > { %2102 = vmatpush3.bf16.msra.mxu0 %v2437_v10  ;;  %v2454_v27 = vld [vmem:[#allocation5 + $0xb0] sm:$0xff]   ;;  %v2458_v31 = vld [vmem:[#allocation5 + $0xb8] sm:$0xff]   ;;  %v2462_v34 = vld [vmem:[#allocation5 + $0x140] sm:$0xff]  }
  0x65   : > { %2166 = vmatpush3.bf16.msra.mxu1 %v2438_v11  ;;  %2103 = vmatprep.subr.bf16.mxu0 %v2439_v12  ;;  %v2463_v35 = vld [vmem:[#allocation5 + $0x100] sm:$0xff]   ;;  %v3065_v36 = vld [vmem:[%s3044_s3 + $0x14] ss:$8 sps:$4 sm:$0xff]   ;;  %v3068_v37 = vld [vmem:[%s3044_s3 + $0x10] ss:$8 sps:$4 sm:$0xff]  }
  0x66   : > { %2167 = vmatprep.subr.bf16.mxu1 %v2440_v13  ;;  %v2467_v38 = vld [vmem:[#allocation5 + $0x1c0] sm:$0xff]   ;;  %v2469_v40 = vld [vmem:[#allocation5 + $0x148] sm:$0xff]   ;;  %v2476_v45 = vld [vmem:[#allocation5 + $0x150] sm:$0xff]  }
  0x67   : > { %v2468_v39 = vld [vmem:[#allocation5 + $0x180] sm:$0xff]   ;;  %v2470_v41 = vld [vmem:[#allocation5 + $0x108] sm:$0xff]   ;;  %v2477_v46 = vld [vmem:[#allocation5 + $0x110] sm:$0xff]  }
  0x68   : > { %2104 = vmatpush3.bf16.msra.mxu0 %v2441_v14  ;;  %v3073_v42 = vld [vmem:[%s3044_s3 + $0x24] ss:$8 sps:$4 sm:$0xff]   ;;  %v3080_v47 = vld [vmem:[%s3044_s3 + $0x20] ss:$8 sps:$4 sm:$0xff]   ;;  %v3083_v48 = vld [vmem:[%s3044_s3 + $0x34] ss:$8 sps:$4 sm:$0xff]  }
  0x69   : > { %2168 = vmatpush3.bf16.msra.mxu1 %v2442_v15  ;;  %2105 = vmatprep.subr.bf16.mxu0 %v2443_v16  ;;  %v2474_v43 = vld [vmem:[#allocation5 + $0x1c8] sm:$0xff]   ;;  %v2481_v49 = vld [vmem:[#allocation5 + $0x1d0] sm:$0xff]   ;;  %v2483_v51 = vld [vmem:[#allocation5 + $0x158] sm:$0xff]  }
  0x6a   : > { %2169 = vmatprep.subr.bf16.mxu1 %v2444_v17  ;;  %v2475_v44 = vld [vmem:[#allocation5 + $0x188] sm:$0xff]   ;;  %v2482_v50 = vld [vmem:[#allocation5 + $0x190] sm:$0xff]   ;;  %v2484_v52 = vld [vmem:[#allocation5 + $0x118] sm:$0xff]  }
  0x6b   : > { %v3089_v53 = vld [vmem:[%s3044_s3 + $0x30] ss:$8 sps:$4 sm:$0xff]   ;;  %v3093_v55 = vld [vmem:[%s3044_s3 + $0x44] ss:$8 sps:$4 sm:$0xff]   ;;  %v2487_v63 = vld [vmem:[%s3044_s3 + $0x40] ss:$8 sps:$4 sm:$0xff]  }
  0x6c   : > { %2106 = vmatpush3.bf16.msra.mxu0 %v2445_v18  ;;  %v2488_v54 = vld [vmem:[#allocation5 + $0x1d8] sm:$0xff]   ;;  %v2490_v57 = vld [vmem:[#allocation5 + $0x160] sm:$0xff]   ;;  %v2497_v61 = vld [vmem:[#allocation5 + $0x168] sm:$0xff]  }
  0x6d   : > { %2170 = vmatpush3.bf16.msra.mxu1 %v2446_v19  ;;  %2107 = vmatprep.subr.bf16.mxu0 %v2447_v20  ;;  %v2489_v56 = vld [vmem:[#allocation5 + $0x198] sm:$0xff]   ;;  %v2491_v58 = vld [vmem:[#allocation5 + $0x120] sm:$0xff]   ;;  %v2498_v62 = vld [vmem:[#allocation5 + $0x128] sm:$0xff]  }
  0x6e   : > { %2171 = vmatprep.subr.bf16.mxu1 %v2448_v21  ;;  %v2495_v59 = vld [vmem:[#allocation5 + $0x1e0] sm:$0xff]   ;;  %v2492_v0 = vld [vmem:[%s3044_s3 + $0x54] ss:$8 sps:$4 sm:$0xff]   ;;  %v2502_v1 = vld [vmem:[#allocation5 + $0x1e8] sm:$0xff]  }
  0x6f   : > { %v2496_v60 = vld [vmem:[#allocation5 + $0x1a0] sm:$0xff]   ;;  %v2503_v2 = vld [vmem:[#allocation5 + $0x1a8] sm:$0xff]   ;;  %v2504_v3 = vld [vmem:[#allocation5 + $0x170] sm:$0xff]  }
  0x70   : > { %2108 = vmatpush3.bf16.msra.mxu0 %v2449_v22  ;;  %v2505_v4 = vld [vmem:[#allocation5 + $0x130] sm:$0xff]   ;;  %v2499_v7 = vld [vmem:[%s3044_s3 + $0x64] ss:$8 sps:$4 sm:$0xff]   ;;  %v2511_v9 = vld [vmem:[#allocation5 + $0x178] sm:$0xff]  }
  0x71   : > { %2172 = vmatpush3.bf16.msra.mxu1 %v2450_v23  ;;  %2109 = vmatprep.subr.bf16.mxu0 %v2451_v24  ;;  %v2494_v5 = vld [vmem:[%s3044_s3 + $0x50] ss:$8 sps:$4 sm:$0xff]   ;;  %v2501_v13 = vld [vmem:[%s3044_s3 + $0x60] ss:$8 sps:$4 sm:$0xff]   ;;  %v2506_v14 = vld [vmem:[%s3044_s3 + $0x74] ss:$8 sps:$4 sm:$0xff]  }
  0x72   : > { %2173 = vmatprep.subr.bf16.mxu1 %v2452_v25  ;;  %v2509_v6 = vld [vmem:[#allocation5 + $0x1f0] sm:$0xff]   ;;  %v2512_v10 = vld [vmem:[#allocation5 + $0x138] sm:$0xff]  }
  0x73   : > { %v2510_v8 = vld [vmem:[#allocation5 + $0x1b0] sm:$0xff]   ;;  %v2513_v11 = vld [vmem:[#allocation5 + $0x1f8] sm:$0xff]  }
  0x74   : > { %2110 = vmatpush3.bf16.msra.mxu0 %v2453_v26  ;;  %v2514_v12 = vld [vmem:[#allocation5 + $0x1b8] sm:$0xff]  }
  0x75   : > { %2174 = vmatpush3.bf16.msra.mxu1 %v2454_v27  ;;  %2111 = vmatprep.subr.bf16.mxu0 %v2455_v28  ;;  %v2508_v15 = vld [vmem:[%s3044_s3 + $0x70] ss:$8 sps:$4 sm:$0xff]  }
  0x76   : > { %2175 = vmatprep.subr.bf16.mxu1 %v2456_v29 }
  0x78   : > { %2112 = vmatpush3.bf16.msra.mxu0 %v2457_v30 }
  0x79   : > { %2176 = vmatpush3.bf16.msra.mxu1 %v2458_v31  ;;  %2225 = vmatprep.subr.bf16.mxu0 %v2462_v34 }
  0x7a   : > { %2289 = vmatprep.subr.bf16.mxu1 %v2467_v38 }
  0x7b   : > { %438 = vmatmul.mubr.bf16.vlgmr.msra.gmra.mrb[0].mxu0 %v3058_v33 }
  0x7c   : > { %824 = vmatmul.mubr.bf16.vlgmr.msra.gmra.mrb[0].mxu1 %v3058_v33  ;;  %2226 = vmatpush3.bf16.msra.mxu0 %v2463_v35 }
  0x7d   : > { %445 = vmatprep.mubr.bf16.mxu0 %v3065_v36  ;;  %831 = vmatprep.mubr.bf16.mxu1 %v3065_v36 }
  0x7e   : > { %2290 = vmatpush3.bf16.msra.mxu1 %v2468_v39  ;;  %2227 = vmatprep.subr.bf16.mxu0 %v2469_v40 }
  0x7f   : > { %2291 = vmatprep.subr.bf16.mxu1 %v2474_v43 }
  0x80   : > { %2228 = vmatpush3.bf16.msra.mxu0 %v2470_v41 }
  0x81   : > { %2229 = vmatprep.subr.bf16.mxu0 %v2476_v45 }
  0x82   : > { %2292 = vmatpush3.bf16.msra.mxu1 %v2475_v44 }
  0x83   : > { %446 = vmatmul.mubr.bf16.gmra.mrb[4].mxu0 %v3068_v37  ;;  %2293 = vmatprep.subr.bf16.mxu1 %v2481_v49 }
  0x84   : > { %832 = vmatmul.mubr.bf16.gmra.mrb[4].mxu1 %v3068_v37  ;;  %453 = vmatprep.mubr.bf16.mxu0 %v3073_v42 }
  0x85   : > { %839 = vmatprep.mubr.bf16.mxu1 %v3073_v42  ;;  %2230 = vmatpush3.bf16.msra.mxu0 %v2477_v46 }
  0x86   : > { %2294 = vmatpush3.bf16.msra.mxu1 %v2482_v50  ;;  %2231 = vmatprep.subr.bf16.mxu0 %v2483_v51 }
  0x87   : > { %2295 = vmatprep.subr.bf16.mxu1 %v2488_v54 }
  0x89   : > { %2232 = vmatpush3.bf16.msra.mxu0 %v2484_v52 }
  0x8a   : > { %2296 = vmatpush3.bf16.msra.mxu1 %v2489_v56  ;;  %2233 = vmatprep.subr.bf16.mxu0 %v2490_v57 }
  0x8b   : > { %454 = vmatmul.mubr.bf16.gmra.mrb[8].mxu0 %v3080_v47  ;;  %2297 = vmatprep.subr.bf16.mxu1 %v2495_v59 }
  0x8c   : > { %840 = vmatmul.mubr.bf16.gmra.mrb[8].mxu1 %v3080_v47  ;;  %461 = vmatprep.mubr.bf16.mxu0 %v3083_v48 }
  0x8d   : > { %847 = vmatprep.mubr.bf16.mxu1 %v3083_v48  ;;  %2234 = vmatpush3.bf16.msra.mxu0 %v2491_v58 }
  0x8e   : > { %2298 = vmatpush3.bf16.msra.mxu1 %v2496_v60  ;;  %2235 = vmatprep.subr.bf16.mxu0 %v2497_v61 }
  0x8f   : > { %2299 = vmatprep.subr.bf16.mxu1 %v2502_v1 }
  0x91   : > { %2236 = vmatpush3.bf16.msra.mxu0 %v2498_v62 }
  0x92   : > { %2300 = vmatpush3.bf16.msra.mxu1 %v2503_v2  ;;  %2237 = vmatprep.subr.bf16.mxu0 %v2504_v3 }
  0x93   : > { %462 = vmatmul.mubr.bf16.gmra.mrb[12].mxu0 %v3089_v53  ;;  %2301 = vmatprep.subr.bf16.mxu1 %v2509_v6 }
  0x94   : > { %848 = vmatmul.mubr.bf16.gmra.mrb[12].mxu1 %v3089_v53  ;;  %469 = vmatprep.mubr.bf16.mxu0 %v3093_v55 }
  0x95   : > { %855 = vmatprep.mubr.bf16.mxu1 %v3093_v55  ;;  %2238 = vmatpush3.bf16.msra.mxu0 %v2505_v4 }
  0x96   : > { %2302 = vmatpush3.bf16.msra.mxu1 %v2510_v8  ;;  %2239 = vmatprep.subr.bf16.mxu0 %v2511_v9 }
  0x97   : > { %2303 = vmatprep.subr.bf16.mxu1 %v2513_v11 }
  0x99   : > { %2240 = vmatpush3.bf16.msra.mxu0 %v2512_v10 }
  0x9a   : > { %2304 = vmatpush3.bf16.msra.mxu1 %v2514_v12 }
  0x9b   : > { %470 = vmatmul.mubr.bf16.gmra.mrb[16].mxu0 %v2487_v63 }
  0x9c   : > { %856 = vmatmul.mubr.bf16.gmra.mrb[16].mxu1 %v2487_v63  ;;  %477 = vmatprep.mubr.bf16.mxu0 %v2492_v0 }
  0x9d   : > { %863 = vmatprep.mubr.bf16.mxu1 %v2492_v0 }
  0xa3   : > { %478 = vmatmul.mubr.bf16.gmra.mrb[20].mxu0 %v2494_v5 }
  0xa4   : > { %864 = vmatmul.mubr.bf16.gmra.mrb[20].mxu1 %v2494_v5  ;;  %485 = vmatprep.mubr.bf16.mxu0 %v2499_v7 }
  0xa5   : > { %871 = vmatprep.mubr.bf16.mxu1 %v2499_v7 }
  0xab   : > { %486 = vmatmul.mubr.bf16.gmra.mrb[24].mxu0 %v2501_v13 }
  0xac   : > { %872 = vmatmul.mubr.bf16.gmra.mrb[24].mxu1 %v2501_v13  ;;  %493 = vmatprep.mubr.bf16.mxu0 %v2506_v14 }
  0xad   : > { %879 = vmatprep.mubr.bf16.mxu1 %v2506_v14 }
  0xb3   : > { %494 = vmatmul.mubr.bf16.gmra.mrb[28].mxu0 %v2508_v15 }
  0xb4   : > { %880 = vmatmul.mubr.bf16.gmra.mrb[28].mxu1 %v2508_v15  ;;  %1210 = vmatprep.mubr.bf16.mxu0 %v3055_v32 }
  0xb5   : > { %1597 = vmatprep.mubr.bf16.mxu1 %v3055_v32 }
  0xbb   : > { %1211 = vmatmul.mubr.bf16.vlgmr.msra.gmra.mrb[32].mxu0 %v3058_v33 }
  0xbc   : > { %1598 = vmatmul.mubr.bf16.vlgmr.msra.gmra.mrb[32].mxu1 %v3058_v33  ;;  %1218 = vmatprep.mubr.bf16.mxu0 %v3065_v36 }
  0xbd   : > { %1605 = vmatprep.mubr.bf16.mxu1 %v3065_v36 }
  0xc3   : > { %1219 = vmatmul.mubr.bf16.gmra.mrb[36].mxu0 %v3068_v37 }
  0xc4   : > { %1606 = vmatmul.mubr.bf16.gmra.mrb[36].mxu1 %v3068_v37  ;;  %1226 = vmatprep.mubr.bf16.mxu0 %v3073_v42 }
  0xc5   : > { %1613 = vmatprep.mubr.bf16.mxu1 %v3073_v42 }
  0xcb   : > { %1227 = vmatmul.mubr.bf16.gmra.mrb[40].mxu0 %v3080_v47 }
  0xcc   : > { %1614 = vmatmul.mubr.bf16.gmra.mrb[40].mxu1 %v3080_v47  ;;  %1234 = vmatprep.mubr.bf16.mxu0 %v3083_v48 }
  0xcd   : > { %1621 = vmatprep.mubr.bf16.mxu1 %v3083_v48 }
  0xd3   : > { %1235 = vmatmul.mubr.bf16.gmra.mrb[44].mxu0 %v3089_v53 }
  0xd4   : > { %1622 = vmatmul.mubr.bf16.gmra.mrb[44].mxu1 %v3089_v53  ;;  %1242 = vmatprep.mubr.bf16.mxu0 %v3093_v55 }
  0xd5   : > { %1629 = vmatprep.mubr.bf16.mxu1 %v3093_v55 }
  0xdb   : > { %1243 = vmatmul.mubr.bf16.gmra.mrb[48].mxu0 %v2487_v63 }
  0xdc   : > { %1630 = vmatmul.mubr.bf16.gmra.mrb[48].mxu1 %v2487_v63  ;;  %1250 = vmatprep.mubr.bf16.mxu0 %v2492_v0 }
  0xdd   : > { %1637 = vmatprep.mubr.bf16.mxu1 %v2492_v0 }
  0xe3   : > { %1251 = vmatmul.mubr.bf16.gmra.mrb[52].mxu0 %v2494_v5 }
  0xe4   : > { %1638 = vmatmul.mubr.bf16.gmra.mrb[52].mxu1 %v2494_v5  ;;  %1258 = vmatprep.mubr.bf16.mxu0 %v2499_v7 }
  0xe5   : > { %1645 = vmatprep.mubr.bf16.mxu1 %v2499_v7 }
  0xeb   : > { %1259 = vmatmul.mubr.bf16.gmra.mrb[56].mxu0 %v2501_v13 }
  0xec   : > { %1646 = vmatmul.mubr.bf16.gmra.mrb[56].mxu1 %v2501_v13  ;;  %1266 = vmatprep.mubr.bf16.mxu0 %v2506_v14 }
  0xed   : > { %1653 = vmatprep.mubr.bf16.mxu1 %v2506_v14 }
  0xf3   : > { %1267 = vmatmul.mubr.bf16.gmra.mrb[60].mxu0 %v2508_v15 }
  0xf4   : > { %1654 = vmatmul.mubr.bf16.gmra.mrb[60].mxu1 %v2508_v15 }
 0x14e   : > { %v2113_v16 = vpop.f32.mrb[0].mxu0 }
 0x14f   : > { %v2177_v17 = vpop.f32.mrb[0].mxu1  ;;  %v2114_v18 = vpop.f32.mrb[1].mxu0 }
 0x150   : > { %v3124_v19 = vadd.f32 %v2114_v18, %v2113_v16  ;;  %v2178_v20 = vpop.f32.mrb[1].mxu1  ;;  %v2116_v21 = vpop.f32.mrb[2].mxu0 }
 0x151   : > { %v3126_v22 = vadd.f32 %v2178_v20, %v2177_v17  ;;  %v2180_v23 = vpop.f32.mrb[2].mxu1  ;;  %v2117_v24 = vpop.f32.mrb[3].mxu0 }
 0x152   : > { %v3128_v25 = vadd.f32 %v2117_v24, %v2116_v21  ;;  %v2181_v26 = vpop.f32.mrb[3].mxu1  ;;  %502 = vmax.xlane.f32.xlu0 %v3124_v19 }
 0x153   : > { %v3131_v27 = vadd.f32 %v2181_v26, %v2180_v23 }
 0x155   : > { %890 = vmax.xlane.f32.xlu1 %v3131_v27 }
 0x156   : > { %v2119_v28 = vpop.f32.mrb[4].mxu0  ;;  %888 = vmax.xlane.f32.xlu0 %v3126_v22 }
 0x157   : > { %v2120_v29 = vpop.f32.mrb[5].mxu0  ;;  %v2183_v30 = vpop.f32.mrb[4].mxu1 }
 0x158   : > { %v3135_v31 = vadd.f32 %v2120_v29, %v2119_v28  ;;  %v2122_v32 = vpop.f32.mrb[6].mxu0  ;;  %v2184_v33 = vpop.f32.mrb[5].mxu1 }
 0x159   : > { %v2123_v34 = vpop.f32.mrb[7].mxu0  ;;  %v3137_v35 = vadd.f32 %v2184_v33, %v2183_v30  ;;  %v2186_v36 = vpop.f32.mrb[6].mxu1 }
 0x15a   : > { %v3139_v37 = vadd.f32 %v2123_v34, %v2122_v32  ;;  %506 = vmax.xlane.f32.xlu1 %v3135_v31  ;;  %504 = vmax.xlane.f32.xlu0 %v3128_v25  ;;  %v2187_v38 = vpop.f32.mrb[7].mxu1 }
 0x15b   : > { %v3143_v39 = vadd.f32 %v2187_v38, %v2186_v36 }
 0x15e   : > { %v2125_v40 = vpop.f32.mrb[8].mxu0  ;;  %508 = vmax.xlane.f32.xlu1 %v3139_v37  ;;  %892 = vmax.xlane.f32.xlu0 %v3137_v35 }
 0x15f   : > { %v2126_v41 = vpop.f32.mrb[9].mxu0  ;;  %v2189_v42 = vpop.f32.mrb[8].mxu1 }
 0x160   : > { %v3147_v43 = vadd.f32 %v2126_v41, %v2125_v40  ;;  %v2128_v44 = vpop.f32.mrb[10].mxu0  ;;  %v2190_v45 = vpop.f32.mrb[9].mxu1 }
 0x161   : > { %v2129_v46 = vpop.f32.mrb[11].mxu0  ;;  %v3149_v47 = vadd.f32 %v2190_v45, %v2189_v42  ;;  %v2192_v48 = vpop.f32.mrb[10].mxu1 }
 0x162   : > { %894 = vmax.xlane.f32.xlu1 %v3143_v39  ;;  %510 = vmax.xlane.f32.xlu0 %v3147_v43  ;;  %v3153_v49 = vadd.f32 %v2129_v46, %v2128_v44  ;;  %v2193_v50 = vpop.f32.mrb[11].mxu1 }
 0x163   : > { %v3155_v51 = vadd.f32 %v2193_v50, %v2192_v48 }
 0x166   : > { %v2131_v52 = vpop.f32.mrb[12].mxu0  ;;  %512 = vmax.xlane.f32.xlu1 %v3153_v49  ;;  %896 = vmax.xlane.f32.xlu0 %v3149_v47 }
 0x167   : > { %v2132_v53 = vpop.f32.mrb[13].mxu0  ;;  %v2195_v54 = vpop.f32.mrb[12].mxu1 }
 0x168   : > { %v3159_v55 = vadd.f32 %v2132_v53, %v2131_v52  ;;  %v2134_v56 = vpop.f32.mrb[14].mxu0  ;;  %v2196_v57 = vpop.f32.mrb[13].mxu1 }
 0x169   : > { %v2135_v58 = vpop.f32.mrb[15].mxu0  ;;  %v3161_v59 = vadd.f32 %v2196_v57, %v2195_v54  ;;  %v2198_v60 = vpop.f32.mrb[14].mxu1 }
 0x16a   : > { %898 = vmax.xlane.f32.xlu1 %v3155_v51  ;;  %514 = vmax.xlane.f32.xlu0 %v3159_v55  ;;  %v3165_v61 = vadd.f32 %v2135_v58, %v2134_v56  ;;  %v2199_v62 = vpop.f32.mrb[15].mxu1 }
 0x16b   : > { %v3167_v63 = vadd.f32 %v2199_v62, %v2198_v60 }
 0x16e   : > { %v2137_v0 = vpop.f32.mrb[16].mxu0  ;;  %516 = vmax.xlane.f32.xlu1 %v3165_v61  ;;  %900 = vmax.xlane.f32.xlu0 %v3161_v59 }
 0x16f   : > { %v2138_v1 = vpop.f32.mrb[17].mxu0  ;;  %v2201_v2 = vpop.f32.mrb[16].mxu1 }
 0x170   : > { %v3171_v3 = vadd.f32 %v2138_v1, %v2137_v0  ;;  %v2140_v4 = vpop.f32.mrb[18].mxu0  ;;  %v2202_v5 = vpop.f32.mrb[17].mxu1 }
 0x171   : > { %v2141_v6 = vpop.f32.mrb[19].mxu0  ;;  %v3173_v7 = vadd.f32 %v2202_v5, %v2201_v2  ;;  %v2204_v8 = vpop.f32.mrb[18].mxu1 }
 0x172   : > { %902 = vmax.xlane.f32.xlu1 %v3167_v63  ;;  %518 = vmax.xlane.f32.xlu0 %v3171_v3  ;;  %v3177_v9 = vadd.f32 %v2141_v6, %v2140_v4  ;;  %v2205_v10 = vpop.f32.mrb[19].mxu1 }
 0x173   : > { %v3179_v11 = vadd.f32 %v2205_v10, %v2204_v8 }
 0x176   : > { %v2143_v12 = vpop.f32.mrb[20].mxu0  ;;  %520 = vmax.xlane.f32.xlu1 %v3177_v9  ;;  %904 = vmax.xlane.f32.xlu0 %v3173_v7 }
 0x177   : > { %v2144_v13 = vpop.f32.mrb[21].mxu0  ;;  %v2207_v14 = vpop.f32.mrb[20].mxu1 }
 0x178   : > { %v3183_v15 = vadd.f32 %v2144_v13, %v2143_v12  ;;  %v2146_v16 = vpop.f32.mrb[22].mxu0  ;;  %v2208_v17 = vpop.f32.mrb[21].mxu1 }
 0x179   : > { %v2147_v18 = vpop.f32.mrb[23].mxu0  ;;  %v3185_v20 = vadd.f32 %v2208_v17, %v2207_v14  ;;  %v2210_v21 = vpop.f32.mrb[22].mxu1 }
 0x17a   : > { %906 = vmax.xlane.f32.xlu1 %v3179_v11  ;;  %522 = vmax.xlane.f32.xlu0 %v3183_v15  ;;  %v3189_v23 = vadd.f32 %v2147_v18, %v2146_v16  ;;  %v2211_v24 = vpop.f32.mrb[23].mxu1 }
 0x17b   : > { %v3191_v26 = vadd.f32 %v2211_v24, %v2210_v21 }
 0x17e   : > { %v2149_v28 = vpop.f32.mrb[24].mxu0  ;;  %524 = vmax.xlane.f32.xlu1 %v3189_v23  ;;  %908 = vmax.xlane.f32.xlu0 %v3185_v20 }
 0x17f   : > { %v2150_v29 = vpop.f32.mrb[25].mxu0  ;;  %v2213_v30 = vpop.f32.mrb[24].mxu1 }
 0x180   : > { %v3195_v32 = vadd.f32 %v2150_v29, %v2149_v28  ;;  %v2152_v33 = vpop.f32.mrb[26].mxu0  ;;  %v2214_v34 = vpop.f32.mrb[25].mxu1 }
 0x181   : > { %v2153_v36 = vpop.f32.mrb[27].mxu0  ;;  %v3197_v38 = vadd.f32 %v2214_v34, %v2213_v30  ;;  %v2216_v40 = vpop.f32.mrb[26].mxu1 }
 0x182   : > { %910 = vmax.xlane.f32.xlu1 %v3191_v26  ;;  %526 = vmax.xlane.f32.xlu0 %v3195_v32  ;;  %v3201_v41 = vadd.f32 %v2153_v36, %v2152_v33  ;;  %v2217_v42 = vpop.f32.mrb[27].mxu1 }
 0x183   : > { %v3203_v44 = vadd.f32 %v2217_v42, %v2216_v40 }
 0x186   : > { %v2155_v45 = vpop.f32.mrb[28].mxu0  ;;  %528 = vmax.xlane.f32.xlu1 %v3201_v41  ;;  %912 = vmax.xlane.f32.xlu0 %v3197_v38 }
 0x187   : > { %v2156_v46 = vpop.f32.mrb[29].mxu0  ;;  %v2219_v48 = vpop.f32.mrb[28].mxu1 }
 0x188   : > { %v3207_v50 = vadd.f32 %v2156_v46, %v2155_v45  ;;  %v2158_v52 = vpop.f32.mrb[30].mxu0  ;;  %v2220_v53 = vpop.f32.mrb[29].mxu1 }
 0x189   : > { %v2159_v54 = vpop.f32.mrb[31].mxu0  ;;  %v3209_v56 = vadd.f32 %v2220_v53, %v2219_v48  ;;  %v2222_v57 = vpop.f32.mrb[30].mxu1 }
 0x18a   : > { %914 = vmax.xlane.f32.xlu1 %v3203_v44  ;;  %530 = vmax.xlane.f32.xlu0 %v3207_v50  ;;  %v3213_v58 = vadd.f32 %v2159_v54, %v2158_v52  ;;  %v2223_v60 = vpop.f32.mrb[31].mxu1 }
 0x18b   : > { %v3215_v62 = vadd.f32 %v2223_v60, %v2222_v57 }
 0x18e   : > { %v2241_v0 = vpop.f32.mrb[32].mxu0  ;;  %532 = vmax.xlane.f32.xlu1 %v3213_v58  ;;  %916 = vmax.xlane.f32.xlu0 %v3209_v56 }
 0x18f   : > { %v2242_v1 = vpop.f32.mrb[33].mxu0  ;;  %v2305_v2 = vpop.f32.mrb[32].mxu1 }
 0x190   : > { %v3219_v4 = vadd.f32 %v2242_v1, %v2241_v0  ;;  %v2244_v5 = vpop.f32.mrb[34].mxu0  ;;  %v2306_v6 = vpop.f32.mrb[33].mxu1 }
 0x191   : > { %v2245_v8 = vpop.f32.mrb[35].mxu0  ;;  %v3221_v10 = vadd.f32 %v2306_v6, %v2305_v2  ;;  %v2308_v12 = vpop.f32.mrb[34].mxu1 }
 0x192   : > { %918 = vmax.xlane.f32.xlu1 %v3215_v62  ;;  %1275 = vmax.xlane.f32.xlu0 %v3219_v4  ;;  %v3225_v13 = vadd.f32 %v2245_v8, %v2244_v5  ;;  %v2309_v14 = vpop.f32.mrb[35].mxu1 }
 0x193   : > { %v3227_v16 = vadd.f32 %v2309_v14, %v2308_v12 }
 0x196   : > { %v2247_v17 = vpop.f32.mrb[36].mxu0  ;;  %1277 = vmax.xlane.f32.xlu1 %v3225_v13  ;;  %1662 = vmax.xlane.f32.xlu0 %v3221_v10 }
 0x197   : > { %v2248_v18 = vpop.f32.mrb[37].mxu0  ;;  %v2311_v21 = vpop.f32.mrb[36].mxu1 }
 0x198   : > { %v3231_v24 = vadd.f32 %v2248_v18, %v2247_v17  ;;  %v2250_v28 = vpop.f32.mrb[38].mxu0  ;;  %v2312_v29 = vpop.f32.mrb[37].mxu1 }
 0x199   : > { %v2251_v30 = vpop.f32.mrb[39].mxu0  ;;  %v3233_v33 = vadd.f32 %v2312_v29, %v2311_v21  ;;  %v2314_v34 = vpop.f32.mrb[38].mxu1 }
 0x19a   : > { %1664 = vmax.xlane.f32.xlu1 %v3227_v16  ;;  %1279 = vmax.xlane.f32.xlu0 %v3231_v24  ;;  %v3237_v36 = vadd.f32 %v2251_v30, %v2250_v28  ;;  %v2315_v40 = vpop.f32.mrb[39].mxu1 }
 0x19b   : > { %v3239_v42 = vadd.f32 %v2315_v40, %v2314_v34 }
 0x19e   : > { %v2253_v45 = vpop.f32.mrb[40].mxu0  ;;  %1281 = vmax.xlane.f32.xlu1 %v3237_v36  ;;  %1666 = vmax.xlane.f32.xlu0 %v3233_v33 }
 0x19f   : > { %v2254_v46 = vpop.f32.mrb[41].mxu0  ;;  %v2317_v48 = vpop.f32.mrb[40].mxu1 }
 0x1a0   : > { %v3243_v52 = vadd.f32 %v2254_v46, %v2253_v45  ;;  %v2256_v53 = vpop.f32.mrb[42].mxu0  ;;  %v2318_v54 = vpop.f32.mrb[41].mxu1 }
 0x1a1   : > { %v2257_v57 = vpop.f32.mrb[43].mxu0  ;;  %v3245_v60 = vadd.f32 %v2318_v54, %v2317_v48  ;;  %v2320_v0 = vpop.f32.mrb[42].mxu1 }
 0x1a2   : > { %1668 = vmax.xlane.f32.xlu1 %v3239_v42  ;;  %1283 = vmax.xlane.f32.xlu0 %v3243_v52  ;;  %v3249_v1 = vadd.f32 %v2257_v57, %v2256_v53  ;;  %v2321_v2 = vpop.f32.mrb[43].mxu1 }
 0x1a3   : > { %v3251_v5 = vadd.f32 %v2321_v2, %v2320_v0 }
 0x1a6   : > { %v2259_v6 = vpop.f32.mrb[44].mxu0  ;;  %1285 = vmax.xlane.f32.xlu1 %v3249_v1  ;;  %1670 = vmax.xlane.f32.xlu0 %v3245_v60 }
 0x1a7   : > { %v2260_v8 = vpop.f32.mrb[45].mxu0  ;;  %v2323_v12 = vpop.f32.mrb[44].mxu1 }
 0x1a8   : > { %v3255_v14 = vadd.f32 %v2260_v8, %v2259_v6  ;;  %v2262_v17 = vpop.f32.mrb[46].mxu0  ;;  %v2324_v18 = vpop.f32.mrb[45].mxu1 }
 0x1a9   : > { %v2263_v21 = vpop.f32.mrb[47].mxu0  ;;  %v3257_v28 = vadd.f32 %v2324_v18, %v2323_v12  ;;  %v2326_v29 = vpop.f32.mrb[46].mxu1 }
 0x1aa   : > { %1672 = vmax.xlane.f32.xlu1 %v3251_v5  ;;  %1287 = vmax.xlane.f32.xlu0 %v3255_v14  ;;  %v3261_v30 = vadd.f32 %v2263_v21, %v2262_v17  ;;  %v2327_v34 = vpop.f32.mrb[47].mxu1 }
 0x1ab   : > { %v3263_v40 = vadd.f32 %v2327_v34, %v2326_v29 }
 0x1ae   : > { %v2265_v45 = vpop.f32.mrb[48].mxu0  ;;  %1289 = vmax.xlane.f32.xlu1 %v3261_v30  ;;  %1674 = vmax.xlane.f32.xlu0 %v3257_v28 }
 0x1af   : > { %v2266_v46 = vpop.f32.mrb[49].mxu0  ;;  %v2329_v48 = vpop.f32.mrb[48].mxu1 }
 0x1b0   : > { %v3267_v53 = vadd.f32 %v2266_v46, %v2265_v45  ;;  %v2268_v54 = vpop.f32.mrb[50].mxu0  ;;  %v2330_v57 = vpop.f32.mrb[49].mxu1 }
 0x1b1   : > { %v2269_v0 = vpop.f32.mrb[51].mxu0  ;;  %v3269_v2 = vadd.f32 %v2330_v57, %v2329_v48  ;;  %v2332_v6 = vpop.f32.mrb[50].mxu1 }
 0x1b2   : > { %3783 = vst [vmem:[#allocation13_spill] sm:$0xff] %v3267_v53  ;;  %1676 = vmax.xlane.f32.xlu1 %v3263_v40  ;;  %1291 = vmax.xlane.f32.xlu0 %v3267_v53  ;;  %v3273_v8 = vadd.f32 %v2269_v0, %v2268_v54  ;;  %v2333_v12 = vpop.f32.mrb[51].mxu1 }
 0x1b3   : > { %3784 = vst [vmem:[#allocation14_spill] sm:$0xff] %v3269_v2  ;;  %v3275_v17 = vadd.f32 %v2333_v12, %v2332_v6 }
 0x1b4   : > { %3785 = vst [vmem:[#allocation15_spill] sm:$0xff] %v3273_v8 }
 0x1b5   : > { %3786 = vst [vmem:[#allocation16_spill] sm:$0xff] %v3275_v17 }
 0x1b6   : > { %v2271_v18 = vpop.f32.mrb[52].mxu0  ;;  %1293 = vmax.xlane.f32.xlu1 %v3273_v8  ;;  %1678 = vmax.xlane.f32.xlu0 %v3269_v2 }
 0x1b7   : > { %v2272_v21 = vpop.f32.mrb[53].mxu0  ;;  %v2335_v29 = vpop.f32.mrb[52].mxu1 }
 0x1b8   : > { %v3279_v34 = vadd.f32 %v2272_v21, %v2271_v18  ;;  %v2274_v45 = vpop.f32.mrb[54].mxu0  ;;  %v2336_v46 = vpop.f32.mrb[53].mxu1 }
 0x1b9   : > { %v2275_v48 = vpop.f32.mrb[55].mxu0  ;;  %v3281_v57 = vadd.f32 %v2336_v46, %v2335_v29  ;;  %v2338_v53 = vpop.f32.mrb[54].mxu1 }
 0x1ba   : > { %3787 = vst [vmem:[#allocation17_spill] sm:$0xff] %v3279_v34  ;;  %1680 = vmax.xlane.f32.xlu1 %v3275_v17  ;;  %1295 = vmax.xlane.f32.xlu0 %v3279_v34  ;;  %v3285_v54 = vadd.f32 %v2275_v48, %v2274_v45  ;;  %v2339_v0 = vpop.f32.mrb[55].mxu1 }
 0x1bb   : > { %3788 = vst [vmem:[#allocation18_spill] sm:$0xff] %v3281_v57  ;;  %v3287_v6 = vadd.f32 %v2339_v0, %v2338_v53 }
 0x1bc   : > { %3789 = vst [vmem:[#allocation19_spill] sm:$0xff] %v3285_v54 }
 0x1bd   : > { %3790 = vst [vmem:[#allocation20_spill] sm:$0xff] %v3287_v6 }
 0x1be   : > { %v2277_v12 = vpop.f32.mrb[56].mxu0  ;;  %1297 = vmax.xlane.f32.xlu1 %v3285_v54  ;;  %1682 = vmax.xlane.f32.xlu0 %v3281_v57 }
 0x1bf   : > { %v2278_v18 = vpop.f32.mrb[57].mxu0  ;;  %v2341_v21 = vpop.f32.mrb[56].mxu1 }
 0x1c0   : > { %v3291_v2 = vadd.f32 %v2278_v18, %v2277_v12  ;;  %v2280_v29 = vpop.f32.mrb[58].mxu0  ;;  %v2342_v46 = vpop.f32.mrb[57].mxu1 }
 0x1c1   : > { %v2281_v8 = vpop.f32.mrb[59].mxu0  ;;  %v3293_v17 = vadd.f32 %v2342_v46, %v2341_v21  ;;  %v2344_v34 = vpop.f32.mrb[58].mxu1 }
 0x1c2   : > { %3791 = vst [vmem:[#allocation21_spill] sm:$0xff] %v3291_v2  ;;  %1684 = vmax.xlane.f32.xlu1 %v3287_v6  ;;  %1299 = vmax.xlane.f32.xlu0 %v3291_v2  ;;  %v3297_v53 = vadd.f32 %v2281_v8, %v2280_v29  ;;  %v2345_v45 = vpop.f32.mrb[59].mxu1 }
 0x1c3   : > { %3792 = vst [vmem:[#allocation22_spill] sm:$0xff] %v3293_v17  ;;  %v3299_v48 = vadd.f32 %v2345_v45, %v2344_v34 }
 0x1c5   : > { %3793 = vst [vmem:[#allocation23_spill] sm:$0xff] %v3299_v48 }
 0x1c6   : > { %v2283_v0 = vpop.f32.mrb[60].mxu0  ;;  %1301 = vmax.xlane.f32.xlu1 %v3297_v53  ;;  %1686 = vmax.xlane.f32.xlu0 %v3293_v17 }
 0x1c7   : > { %v2284_v12 = vpop.f32.mrb[61].mxu0  ;;  %v2347_v18 = vpop.f32.mrb[60].mxu1 }
 0x1c8   : > { %v3303_v57 = vadd.f32 %v2284_v12, %v2283_v0  ;;  %v2286_v21 = vpop.f32.mrb[62].mxu0  ;;  %v2348_v46 = vpop.f32.mrb[61].mxu1 }
 0x1c9   : > { %v2287_v54 = vpop.f32.mrb[63].mxu0  ;;  %v3305_v6 = vadd.f32 %v2348_v46, %v2347_v18  ;;  %v2350_v2 = vpop.f32.mrb[62].mxu1 }
 0x1ca   : > { %3794 = vst [vmem:[#allocation24_spill] sm:$0xff] %v3303_v57  ;;  %1688 = vmax.xlane.f32.xlu1 %v3299_v48  ;;  %1303 = vmax.xlane.f32.xlu0 %v3303_v57  ;;  %v3309_v8 = vadd.f32 %v2287_v54, %v2286_v21  ;;  %v2351_v34 = vpop.f32.mrb[63].mxu1 }
 0x1cb   : > { %3795 = vst [vmem:[#allocation25_spill] sm:$0xff] %v3305_v6  ;;  %v3311_v29 = vadd.f32 %v2351_v34, %v2350_v2 }
 0x1cc   : > { %3796 = vst [vmem:[#allocation26_spill] sm:$0xff] %v3309_v8 }
 0x1cd   : > { %3797 = vst [vmem:[#allocation27_spill] sm:$0xff] %v3311_v29 }
 0x1ce   : > { %1305 = vmax.xlane.f32.xlu1 %v3309_v8  ;;  %1690 = vmax.xlane.f32.xlu0 %v3305_v6 }
 0x1d2   : > { %1692 = vmax.xlane.f32.xlu1 %v3311_v29 }
 0x1df   : > { %v503_v45 = vpop.xlane.xlu0 %502 }
 0x1e0   : > { %v534_v0 = vsub.f32 %v3124_v19, %v503_v45 }
 0x1e2   : > { %v550_v12 = vmul.f32 1.442695, %v534_v0  ;;  %v891_v18 = vpop.xlane.xlu1 %890 }
 0x1e3   : > { %v889_v46 = vpop.xlane.xlu0 %888  ;;  %v921_v2 = vsub.f32 %v3131_v27, %v891_v18 }
 0x1e4   : > { %2515 = vpow2.f32 %v550_v12  ;;  %v920_v57 = vsub.f32 %v3126_v22, %v889_v46 }
 0x1e5   : > { %v938_v45 = vmul.f32 1.442695, %v921_v2 }
 0x1e6   : > { %v936_v54 = vmul.f32 1.442695, %v920_v57 }
 0x1e7   : > { %v507_v21 = vpop.xlane.xlu1 %506  ;;  %v505_v48 = vpop.xlane.xlu0 %504 }
 0x1e8   : > { %2517 = vpow2.f32 %v936_v54  ;;  %v536_v34 = vsub.f32 %v3135_v31, %v507_v21  ;;  %v535_v8 = vsub.f32 %v3128_v25, %v505_v48 }
 0x1ea   : > { %v554_v29 = vmul.f32 1.442695, %v536_v34  ;;  %v552_v6 = vmul.f32 1.442695, %v535_v8 }
 0x1eb   : > { %v509_v17 = vpop.xlane.xlu1 %508  ;;  %v893_v19 = vpop.xlane.xlu0 %892 }
 0x1ec   : > { %2519 = vpow2.f32 %v554_v29  ;;  %v537_v0 = vsub.f32 %v3139_v37, %v509_v17  ;;  %v922_v22 = vsub.f32 %v3137_v35, %v893_v19 }
 0x1ed   : > { %2521 = vpow2.f32 %v552_v6 }
 0x1ee   : > { %v3323_v57 = vpop.eup %2515  ;;  %v940_v12 = vmul.f32 1.442695, %v922_v22  ;;  %2523 = vpow2.f32 %v938_v45  ;;  %v556_v25 = vmul.f32 1.442695, %v537_v0 }
 0x1ef   : > { %v895_v27 = vpop.xlane.xlu1 %894  ;;  %582 = vadd.xlane.f32.xlu0 %v3323_v57  ;;  %v511_v31 = vpop.xlane.xlu0 %510 }
 0x1f0   : > { %v923_v48 = vsub.f32 %v3143_v39, %v895_v27  ;;  %v538_v8 = vsub.f32 %v3147_v43, %v511_v31  ;;  %2525 = vpow2.f32 %v940_v12 }
 0x1f1   : > { %2527 = vpow2.f32 %v556_v25 }
 0x1f2   : > { %v3328_v29 = vpop.eup %2517  ;;  %v558_v37 = vmul.f32 1.442695, %v538_v8  ;;  %v942_v6 = vmul.f32 1.442695, %v923_v48 }
 0x1f3   : > { %v513_v17 = vpop.xlane.xlu1 %512  ;;  %968 = vadd.xlane.f32.xlu0 %v3328_v29  ;;  %v897_v35 = vpop.xlane.xlu0 %896 }
 0x1f4   : > { %v539_v18 = vsub.f32 %v3153_v49, %v513_v17  ;;  %v924_v46 = vsub.f32 %v3149_v47, %v897_v35  ;;  %2529 = vpow2.f32 %v558_v37 }
 0x1f5   : > { %2531 = vpow2.f32 %v942_v6 }
 0x1f6   : > { %v3333_v54 = vpop.eup %2519  ;;  %v944_v39 = vmul.f32 1.442695, %v924_v46  ;;  %v560_v34 = vmul.f32 1.442695, %v539_v18 }
 0x1f7   : > { %v3335_v21 = vpop.eup %2521  ;;  %v899_v43 = vpop.xlane.xlu1 %898  ;;  %586 = vadd.xlane.f32.xlu0 %v3333_v54 }
 0x1f8   : > { %v515_v2 = vpop.xlane.xlu0 %514  ;;  %v925_v19 = vsub.f32 %v3155_v51, %v899_v43  ;;  %584 = vadd.xlane.f32.xlu1 %v3335_v21  ;;  %2533 = vpow2.f32 %v944_v39  ;;  %v3341_v47 = vpop.eup %2523 }
 0x1f9   : > { %v540_v49 = vsub.f32 %v3159_v55, %v515_v2  ;;  %2535 = vpow2.f32 %v560_v34 }
 0x1fa   : > { %v3343_v0 = vpop.eup %2525  ;;  %v946_v27 = vmul.f32 1.442695, %v925_v19 }
 0x1fb   : > { %v562_v45 = vmul.f32 1.442695, %v540_v49  ;;  %v517_v22 = vpop.xlane.xlu1 %516  ;;  %972 = vadd.xlane.f32.xlu0 %v3343_v0  ;;  %v3349_v55 = vpop.eup %2527 }
 0x1fc   : > { %v901_v12 = vpop.xlane.xlu0 %900  ;;  %v541_v31 = vsub.f32 %v3165_v61, %v517_v22  ;;  %970 = vadd.xlane.f32.xlu1 %v3341_v47 }
 0x1fd   : > { %v926_v51 = vsub.f32 %v3161_v59, %v901_v12  ;;  %2537 = vpow2.f32 %v562_v45 }
 0x1fe   : > { %v3351_v48 = vpop.eup %2529  ;;  %2539 = vpow2.f32 %v946_v27  ;;  %v564_v17 = vmul.f32 1.442695, %v541_v31 }
 0x1ff   : > { %v948_v25 = vmul.f32 1.442695, %v926_v51  ;;  %v903_v8 = vpop.xlane.xlu1 %902  ;;  %590 = vadd.xlane.f32.xlu0 %v3351_v48  ;;  %v3357_v59 = vpop.eup %2531 }
 0x200   : > { %v519_v37 = vpop.xlane.xlu0 %518  ;;  %v927_v35 = vsub.f32 %v3167_v63, %v903_v8  ;;  %588 = vadd.xlane.f32.xlu1 %v3349_v55 }
 0x201   : > { %v542_v61 = vsub.f32 %v3171_v3, %v519_v37  ;;  %2541 = vpow2.f32 %v948_v25 }
 0x202   : > { %v3359_v18 = vpop.eup %2533  ;;  %2543 = vpow2.f32 %v564_v17  ;;  %v950_v43 = vmul.f32 1.442695, %v927_v35 }
 0x203   : > { %v566_v6 = vmul.f32 1.442695, %v542_v61  ;;  %v521_v46 = vpop.xlane.xlu1 %520  ;;  %976 = vadd.xlane.f32.xlu0 %v3359_v18  ;;  %v3365_v3 = vpop.eup %2535 }
 0x204   : > { %v905_v39 = vpop.xlane.xlu0 %904  ;;  %v543_v2 = vsub.f32 %v3177_v9, %v521_v46  ;;  %974 = vadd.xlane.f32.xlu1 %v3357_v59 }
 0x205   : > { %v928_v63 = vsub.f32 %v3173_v7, %v905_v39  ;;  %2545 = vpow2.f32 %v566_v6 }
 0x206   : > { %2547 = vpow2.f32 %v950_v43  ;;  %v568_v22 = vmul.f32 1.442695, %v543_v2 }
 0x207   : > { %v952_v34 = vmul.f32 1.442695, %v928_v63  ;;  %v3367_v19 = vpop.eup %2537  ;;  %v907_v49 = vpop.xlane.xlu1 %906 }
 0x208   : > { %v523_v45 = vpop.xlane.xlu0 %522  ;;  %v929_v12 = vsub.f32 %v3179_v11, %v907_v49  ;;  %592 = vadd.xlane.f32.xlu1 %v3365_v3  ;;  %594 = vadd.xlane.f32.xlu0 %v3367_v19  ;;  %v3373_v7 = vpop.eup %2539 }
 0x209   : > { %v544_v9 = vsub.f32 %v3183_v15, %v523_v45  ;;  %2549 = vpow2.f32 %v952_v34 }
 0x20a   : > { %2551 = vpow2.f32 %v568_v22  ;;  %v954_v8 = vmul.f32 1.442695, %v929_v12 }
 0x20b   : > { %v570_v27 = vmul.f32 1.442695, %v544_v9  ;;  %v3375_v31 = vpop.eup %2541  ;;  %v525_v51 = vpop.xlane.xlu1 %524 }
 0x20c   : > { %v909_v25 = vpop.xlane.xlu0 %908  ;;  %v545_v37 = vsub.f32 %v3189_v23, %v525_v51  ;;  %978 = vadd.xlane.f32.xlu1 %v3373_v7  ;;  %980 = vadd.xlane.f32.xlu0 %v3375_v31  ;;  %v3381_v15 = vpop.eup %2543 }
 0x20d   : > { %v930_v11 = vsub.f32 %v3185_v20, %v909_v25  ;;  %2553 = vpow2.f32 %v570_v27 }
 0x20e   : > { %2555 = vpow2.f32 %v954_v8  ;;  %v572_v46 = vmul.f32 1.442695, %v545_v37 }
 0x20f   : > { %v956_v17 = vmul.f32 1.442695, %v930_v11  ;;  %v3383_v35 = vpop.eup %2545  ;;  %v911_v61 = vpop.xlane.xlu1 %910 }
 0x210   : > { %v527_v6 = vpop.xlane.xlu0 %526  ;;  %v931_v39 = vsub.f32 %v3191_v26, %v911_v61  ;;  %596 = vadd.xlane.f32.xlu1 %v3381_v15  ;;  %598 = vadd.xlane.f32.xlu0 %v3383_v35  ;;  %v3389_v20 = vpop.eup %2547 }
 0x211   : > { %v546_v23 = vsub.f32 %v3195_v32, %v527_v6  ;;  %2557 = vpow2.f32 %v956_v17 }
 0x212   : > { %2559 = vpow2.f32 %v572_v46  ;;  %v958_v49 = vmul.f32 1.442695, %v931_v39 }
 0x213   : > { %v574_v43 = vmul.f32 1.442695, %v546_v23  ;;  %v3391_v2 = vpop.eup %2549  ;;  %v529_v63 = vpop.xlane.xlu1 %528 }
 0x214   : > { %v913_v34 = vpop.xlane.xlu0 %912  ;;  %v547_v45 = vsub.f32 %v3201_v41, %v529_v63  ;;  %982 = vadd.xlane.f32.xlu1 %v3389_v20  ;;  %984 = vadd.xlane.f32.xlu0 %v3391_v2  ;;  %v3397_v32 = vpop.eup %2551 }
 0x215   : > { %v932_v26 = vsub.f32 %v3197_v38, %v913_v34  ;;  %2561 = vpow2.f32 %v574_v43 }
 0x216   : > { %2563 = vpow2.f32 %v958_v49  ;;  %v576_v51 = vmul.f32 1.442695, %v547_v45 }
 0x217   : > { %v960_v22 = vmul.f32 1.442695, %v932_v26  ;;  %v3399_v12 = vpop.eup %2553  ;;  %v915_v9 = vpop.xlane.xlu1 %914 }
 0x218   : > { %v531_v27 = vpop.xlane.xlu0 %530  ;;  %v933_v25 = vsub.f32 %v3203_v44, %v915_v9  ;;  %600 = vadd.xlane.f32.xlu1 %v3397_v32  ;;  %602 = vadd.xlane.f32.xlu0 %v3399_v12  ;;  %v3405_v38 = vpop.eup %2555 }
 0x219   : > { %v548_v41 = vsub.f32 %v3207_v50, %v531_v27  ;;  %2565 = vpow2.f32 %v960_v22 }
 0x21a   : > { %2567 = vpow2.f32 %v576_v51  ;;  %v962_v61 = vmul.f32 1.442695, %v933_v25 }
 0x21b   : > { %v578_v8 = vmul.f32 1.442695, %v548_v41  ;;  %v3407_v37 = vpop.eup %2557  ;;  %v533_v11 = vpop.xlane.xlu1 %532 }
 0x21c   : > { %v917_v17 = vpop.xlane.xlu0 %916  ;;  %v549_v6 = vsub.f32 %v3213_v58, %v533_v11  ;;  %986 = vadd.xlane.f32.xlu1 %v3405_v38  ;;  %988 = vadd.xlane.f32.xlu0 %v3407_v37  ;;  %v3413_v50 = vpop.eup %2559 }
 0x21d   : > { %v934_v44 = vsub.f32 %v3209_v56, %v917_v17  ;;  %2569 = vpow2.f32 %v578_v8 }
 0x21e   : > { %2571 = vpow2.f32 %v962_v61  ;;  %v580_v63 = vmul.f32 1.442695, %v549_v6 }
 0x21f   : > { %v964_v46 = vmul.f32 1.442695, %v934_v44  ;;  %v3415_v39 = vpop.eup %2561  ;;  %v919_v23 = vpop.xlane.xlu1 %918 }
 0x220   : > { %v1276_v43 = vpop.xlane.xlu0 %1275  ;;  %v935_v34 = vsub.f32 %v3215_v62, %v919_v23  ;;  %604 = vadd.xlane.f32.xlu1 %v3413_v50  ;;  %606 = vadd.xlane.f32.xlu0 %v3415_v39  ;;  %v3421_v56 = vpop.eup %2563 }
 0x221   : > { %v1307_v58 = vsub.f32 %v3219_v4, %v1276_v43  ;;  %2573 = vpow2.f32 %v964_v46 }
 0x222   : > { %2575 = vpow2.f32 %v580_v63  ;;  %v966_v9 = vmul.f32 1.442695, %v935_v34 }
 0x223   : > { %v1323_v49 = vmul.f32 1.442695, %v1307_v58  ;;  %v3423_v45 = vpop.eup %2565  ;;  %v1278_v26 = vpop.xlane.xlu1 %1277 }
 0x224   : > { %v1663_v22 = vpop.xlane.xlu0 %1662  ;;  %v1308_v27 = vsub.f32 %v3225_v13, %v1278_v26  ;;  %990 = vadd.xlane.f32.xlu1 %v3421_v56  ;;  %992 = vadd.xlane.f32.xlu0 %v3423_v45  ;;  %v3429_v4 = vpop.eup %2567 }
 0x225   : > { %v1694_v62 = vsub.f32 %v3221_v10, %v1663_v22  ;;  %2577 = vpow2.f32 %v1323_v49 }
 0x226   : > { %2579 = vpow2.f32 %v966_v9  ;;  %v1325_v11 = vmul.f32 1.442695, %v1308_v27 }
 0x227   : > { %v1710_v51 = vmul.f32 1.442695, %v1694_v62  ;;  %v3431_v25 = vpop.eup %2569  ;;  %v1665_v41 = vpop.xlane.xlu1 %1664 }
 0x228   : > { %v1280_v8 = vpop.xlane.xlu0 %1279  ;;  %v1695_v17 = vsub.f32 %v3227_v16, %v1665_v41  ;;  %608 = vadd.xlane.f32.xlu1 %v3429_v4  ;;  %610 = vadd.xlane.f32.xlu0 %v3431_v25  ;;  %v3437_v10 = vpop.eup %2571 }
 0x229   : > { %v1309_v13 = vsub.f32 %v3231_v24, %v1280_v8  ;;  %2581 = vpow2.f32 %v1710_v51 }
 0x22a   : > { %2583 = vpow2.f32 %v1325_v11  ;;  %v1712_v23 = vmul.f32 1.442695, %v1695_v17 }
 0x22b   : > { %v1327_v61 = vmul.f32 1.442695, %v1309_v13  ;;  %v3439_v6 = vpop.eup %2573  ;;  %v1282_v44 = vpop.xlane.xlu1 %1281 }
 0x22c   : > { %v1667_v46 = vpop.xlane.xlu0 %1666  ;;  %v1310_v43 = vsub.f32 %v3237_v36, %v1282_v44  ;;  %994 = vadd.xlane.f32.xlu1 %v3437_v10  ;;  %996 = vadd.xlane.f32.xlu0 %v3439_v6  ;;  %v3445_v24 = vpop.eup %2575 }
 0x22d   : > { %v1696_v16 = vsub.f32 %v3233_v33, %v1667_v46  ;;  %2585 = vpow2.f32 %v1327_v61 }
 0x22e   : > { %2587 = vpow2.f32 %v1712_v23  ;;  %v1329_v26 = vmul.f32 1.442695, %v1310_v43 }
 0x22f   : > { %v1714_v63 = vmul.f32 1.442695, %v1696_v16  ;;  %v3447_v34 = vpop.eup %2577  ;;  %v1669_v58 = vpop.xlane.xlu1 %1668 }
 0x230   : > { %v1284_v49 = vpop.xlane.xlu0 %1283  ;;  %v1697_v22 = vsub.f32 %v3239_v42, %v1669_v58  ;;  %612 = vadd.xlane.f32.xlu1 %v3445_v24  ;;  %1355 = vadd.xlane.f32.xlu0 %v3447_v34  ;;  %v3453_v33 = vpop.eup %2579 }
 0x231   : > { %v1311_v36 = vsub.f32 %v3243_v52, %v1284_v49  ;;  %2589 = vpow2.f32 %v1714_v63 }
 0x232   : > { %2591 = vpow2.f32 %v1329_v26  ;;  %v1716_v41 = vmul.f32 1.442695, %v1697_v22 }
 0x233   : > { %v1331_v9 = vmul.f32 1.442695, %v1311_v36  ;;  %v3455_v27 = vpop.eup %2581  ;;  %v1286_v62 = vpop.xlane.xlu1 %1285 }
 0x234   : > { %v1671_v51 = vpop.xlane.xlu0 %1670  ;;  %v1312_v8 = vsub.f32 %v3249_v1, %v1286_v62  ;;  %998 = vadd.xlane.f32.xlu1 %v3453_v33  ;;  %1742 = vadd.xlane.f32.xlu0 %v3455_v27  ;;  %v3461_v52 = vpop.eup %2583 }
 0x235   : > { %v1698_v42 = vsub.f32 %v3245_v60, %v1671_v51  ;;  %2593 = vpow2.f32 %v1331_v9 }
 0x236   : > { %2595 = vpow2.f32 %v1716_v41  ;;  %v1333_v44 = vmul.f32 1.442695, %v1312_v8 }
 0x237   : > { %v1718_v11 = vmul.f32 1.442695, %v1698_v42  ;;  %v3463_v17 = vpop.eup %2585  ;;  %v1673_v13 = vpop.xlane.xlu1 %1672 }
 0x238   : > { %v1288_v61 = vpop.xlane.xlu0 %1287  ;;  %v1699_v46 = vsub.f32 %v3251_v5, %v1673_v13  ;;  %1357 = vadd.xlane.f32.xlu1 %v3461_v52  ;;  %1359 = vadd.xlane.f32.xlu0 %v3463_v17  ;;  %v3469_v60 = vpop.eup %2587 }
 0x239   : > { %v1313_v1 = vsub.f32 %v3255_v14, %v1288_v61  ;;  %2597 = vpow2.f32 %v1718_v11 }
 0x23a   : > { %2599 = vpow2.f32 %v1333_v44  ;;  %v1720_v58 = vmul.f32 1.442695, %v1699_v46  ;;  %v3799_v44 = vld [vmem:[#allocation15_spill] sm:$0xff] }
 0x23b   : > { %v1335_v23 = vmul.f32 1.442695, %v1313_v1  ;;  %v3471_v43 = vpop.eup %2589  ;;  %v1290_v16 = vpop.xlane.xlu1 %1289 }
 0x23c   : > { %v1675_v63 = vpop.xlane.xlu0 %1674  ;;  %v1314_v49 = vsub.f32 %v3261_v30, %v1290_v16  ;;  %1744 = vadd.xlane.f32.xlu1 %v3469_v60  ;;  %1746 = vadd.xlane.f32.xlu0 %v3471_v43  ;;  %v3477_v14 = vpop.eup %2591  ;;  %v3798_v30 = vld [vmem:[#allocation13_spill] sm:$0xff] }
 0x23d   : > { %v1700_v5 = vsub.f32 %v3257_v28, %v1675_v63  ;;  %2601 = vpow2.f32 %v1335_v23 }
 0x23e   : > { %2603 = vpow2.f32 %v1720_v58  ;;  %v1337_v62 = vmul.f32 1.442695, %v1314_v49 }
 0x23f   : > { %v1722_v26 = vmul.f32 1.442695, %v1700_v5  ;;  %v3479_v22 = vpop.eup %2593  ;;  %v1677_v36 = vpop.xlane.xlu1 %1676 }
 0x240   : > { %v1292_v9 = vpop.xlane.xlu0 %1291  ;;  %v1701_v51 = vsub.f32 %v3263_v40, %v1677_v36  ;;  %1361 = vadd.xlane.f32.xlu1 %v3477_v14  ;;  %1363 = vadd.xlane.f32.xlu0 %v3479_v22  ;;  %v3485_v28 = vpop.eup %2595  ;;  %v3800_v40 = vld [vmem:[#allocation14_spill] sm:$0xff] }
 0x241   : > { %v1315_v41 = vsub.f32 %v3798_v30, %v1292_v9  ;;  %2605 = vpow2.f32 %v1722_v26  ;;  %v3801_v26 = vld [vmem:[#allocation16_spill] sm:$0xff]  ;;  %v3802_v9 = vld [vmem:[#allocation17_spill] sm:$0xff] }
 0x242   : > { %2607 = vpow2.f32 %v1337_v62  ;;  %v1724_v61 = vmul.f32 1.442695, %v1701_v51 }
 0x243   : > { %v1339_v8 = vmul.f32 1.442695, %v1315_v41  ;;  %v3487_v42 = vpop.eup %2597  ;;  %v1294_v11 = vpop.xlane.xlu1 %1293 }
 0x244   : > { %v1679_v13 = vpop.xlane.xlu0 %1678  ;;  %v1316_v46 = vsub.f32 %v3799_v44, %v1294_v11  ;;  %1748 = vadd.xlane.f32.xlu1 %v3485_v28  ;;  %1750 = vadd.xlane.f32.xlu0 %v3487_v42  ;;  %v3493_v23 = vpop.eup %2599 }
 0x245   : > { %v1702_v1 = vsub.f32 %v3800_v40, %v1679_v13  ;;  %2609 = vpow2.f32 %v1339_v8 }
 0x246   : > { %2611 = vpow2.f32 %v1724_v61  ;;  %v1341_v5 = vmul.f32 1.442695, %v1316_v46  ;;  %v3804_v61 = vld [vmem:[#allocation19_spill] sm:$0xff]  ;;  %v3805_v46 = vld [vmem:[#allocation18_spill] sm:$0xff] }
 0x247   : > { %v1726_v16 = vmul.f32 1.442695, %v1702_v1  ;;  %v3495_v63 = vpop.eup %2601  ;;  %v1681_v58 = vpop.xlane.xlu1 %1680 }
 0x248   : > { %v1296_v49 = vpop.xlane.xlu0 %1295  ;;  %v1703_v36 = vsub.f32 %v3801_v26, %v1681_v58  ;;  %1365 = vadd.xlane.f32.xlu1 %v3493_v23  ;;  %1367 = vadd.xlane.f32.xlu0 %v3495_v63  ;;  %v3501_v51 = vpop.eup %2603 }
 0x249   : > { %v1317_v62 = vsub.f32 %v3802_v9, %v1296_v49  ;;  %2613 = vpow2.f32 %v1726_v16 }
 0x24a   : > { %2615 = vpow2.f32 %v1341_v5  ;;  %v1728_v13 = vmul.f32 1.442695, %v1703_v36  ;;  %v3807_v5 = vld [vmem:[#allocation20_spill] sm:$0xff] }
 0x24b   : > { %v1343_v30 = vmul.f32 1.442695, %v1317_v62  ;;  %v3503_v41 = vpop.eup %2605  ;;  %v1298_v8 = vpop.xlane.xlu1 %1297  ;;  %v3808_v62 = vld [vmem:[#allocation21_spill] sm:$0xff] }
 0x24c   : > { %3803 = vst [vmem:[#allocation13_spill] sm:$0xff] %v3503_v41  ;;  %v1683_v11 = vpop.xlane.xlu0 %1682  ;;  %v1318_v44 = vsub.f32 %v3804_v61, %v1298_v8  ;;  %1752 = vadd.xlane.f32.xlu1 %v3501_v51  ;;  %1754 = vadd.xlane.f32.xlu0 %v3503_v41  ;;  %v3509_v1 = vpop.eup %2607 }
 0x24d   : > { %v1704_v40 = vsub.f32 %v3805_v46, %v1683_v11  ;;  %2617 = vpow2.f32 %v1343_v30 }
 0x24e   : > { %2619 = vpow2.f32 %v1728_v13  ;;  %v1345_v9 = vmul.f32 1.442695, %v1318_v44  ;;  %v3811_v44 = vld [vmem:[#allocation22_spill] sm:$0xff] }
 0x24f   : > { %v1730_v16 = vmul.f32 1.442695, %v1704_v40  ;;  %v3511_v58 = vpop.eup %2609  ;;  %v1685_v49 = vpop.xlane.xlu1 %1684 }
 0x250   : > { %3806 = vst [vmem:[#allocation15_spill] sm:$0xff] %v3511_v58  ;;  %v1300_v26 = vpop.xlane.xlu0 %1299  ;;  %v1705_v36 = vsub.f32 %v3807_v5, %v1685_v49  ;;  %1369 = vadd.xlane.f32.xlu1 %v3509_v1  ;;  %1371 = vadd.xlane.f32.xlu0 %v3511_v58  ;;  %v3517_v11 = vpop.eup %2611 }
 0x251   : > { %v1319_v8 = vsub.f32 %v3808_v62, %v1300_v26  ;;  %2621 = vpow2.f32 %v1730_v16  ;;  %3809 = vst [vmem:[#allocation14_spill] sm:$0xff] %v3517_v11 }
 0x252   : > { %2623 = vpow2.f32 %v1345_v9  ;;  %v1732_v41 = vmul.f32 1.442695, %v1705_v36  ;;  %v3812_v9 = vld [vmem:[#allocation23_spill] sm:$0xff] }
 0x253   : > { %v1347_v30 = vmul.f32 1.442695, %v1319_v8  ;;  %v3519_v61 = vpop.eup %2613  ;;  %v1302_v46 = vpop.xlane.xlu1 %1301 }
 0x254   : > { %3810 = vst [vmem:[#allocation16_spill] sm:$0xff] %v3519_v61  ;;  %v1687_v40 = vpop.xlane.xlu0 %1686  ;;  %v1320_v13 = vsub.f32 %v3297_v53, %v1302_v46  ;;  %1756 = vadd.xlane.f32.xlu1 %v3517_v11  ;;  %1758 = vadd.xlane.f32.xlu0 %v3519_v61  ;;  %v3525_v26 = vpop.eup %2615  ;;  %v3813_v53 = vld [vmem:[#allocation24_spill] sm:$0xff] }
 0x255   : > { %v1706_v49 = vsub.f32 %v3811_v44, %v1687_v40  ;;  %2625 = vpow2.f32 %v1347_v30 }
 0x256   : > { %2627 = vpow2.f32 %v1732_v41  ;;  %v1349_v58 = vmul.f32 1.442695, %v1320_v13  ;;  %v3816_v41 = vld [vmem:[#allocation25_spill] sm:$0xff] }
 0x257   : > { %v1734_v16 = vmul.f32 1.442695, %v1706_v49  ;;  %v3527_v5 = vpop.eup %2617  ;;  %v1689_v62 = vpop.xlane.xlu1 %1688 }
 0x258   : > { %v1304_v8 = vpop.xlane.xlu0 %1303  ;;  %v1707_v36 = vsub.f32 %v3812_v9, %v1689_v62  ;;  %1373 = vadd.xlane.f32.xlu1 %v3525_v26  ;;  %1375 = vadd.xlane.f32.xlu0 %v3527_v5  ;;  %v3533_v40 = vpop.eup %2619  ;;  %v3817_v62 = vld [vmem:[#allocation26_spill] sm:$0xff] }
 0x259   : > { %v1321_v46 = vsub.f32 %v3813_v53, %v1304_v8  ;;  %2629 = vpow2.f32 %v1734_v16  ;;  %3814 = vst [vmem:[#allocation17_spill] sm:$0xff] %v3533_v40 }
 0x25a   : > { %2631 = vpow2.f32 %v1349_v58  ;;  %v1736_v11 = vmul.f32 1.442695, %v1707_v36  ;;  %v3818_v36 = vld [vmem:[#allocation27_spill] sm:$0xff] }
 0x25b   : > { %v1351_v30 = vmul.f32 1.442695, %v1321_v46  ;;  %v3535_v44 = vpop.eup %2621  ;;  %v1306_v49 = vpop.xlane.xlu1 %1305 }
 0x25c   : > { %3815 = vst [vmem:[#allocation19_spill] sm:$0xff] %v3535_v44  ;;  %v1691_v61 = vpop.xlane.xlu0 %1690  ;;  %1760 = vadd.xlane.f32.xlu1 %v3533_v40  ;;  %1762 = vadd.xlane.f32.xlu0 %v3535_v44  ;;  %v1322_v9 = vsub.f32 %v3817_v62, %v1306_v49  ;;  %v3541_v8 = vpop.eup %2623 }
 0x25d   : > { %v1708_v13 = vsub.f32 %v3816_v41, %v1691_v61  ;;  %2633 = vpow2.f32 %v1351_v30 }
 0x25e   : > { %2635 = vpow2.f32 %v1736_v11  ;;  %v1353_v58 = vmul.f32 1.442695, %v1322_v9 }
 0x25f   : > { %v1738_v16 = vmul.f32 1.442695, %v1708_v13  ;;  %v3543_v53 = vpop.eup %2625  ;;  %v1693_v46 = vpop.xlane.xlu1 %1692 }
 0x260   : > { %1377 = vadd.xlane.f32.xlu1 %v3541_v8  ;;  %1379 = vadd.xlane.f32.xlu0 %v3543_v53  ;;  %v1709_v44 = vsub.f32 %v3818_v36, %v1693_v46  ;;  %v3548_v40 = vpop.eup %2627 }
 0x261   : > { %2637 = vpow2.f32 %v1738_v16 }
 0x262   : > { %2639 = vpow2.f32 %v1353_v58  ;;  %v1740_v30 = vmul.f32 1.442695, %v1709_v44 }
 0x263   : > { %v3550_v61 = vpop.eup %2629 }
 0x264   : > { %1764 = vadd.xlane.f32.xlu1 %v3548_v40  ;;  %1766 = vadd.xlane.f32.xlu0 %v3550_v61  ;;  %v3554_v49 = vpop.eup %2631  ;;  %2641 = vpow2.f32 %v1740_v30 }
 0x267   : > { %v3556_v11 = vpop.eup %2633 }
 0x268   : > { %1381 = vadd.xlane.f32.xlu1 %v3554_v49  ;;  %1383 = vadd.xlane.f32.xlu0 %v3556_v11  ;;  %v3560_v41 = vpop.eup %2635 }
 0x269   : > { %3819 = vst [vmem:[#allocation18_spill] sm:$0xff] %v3560_v41 }
 0x26b   : > { %v3562_v13 = vpop.eup %2637 }
 0x26c   : > { %3820 = vst [vmem:[#allocation20_spill] sm:$0xff] %v3562_v13  ;;  %1768 = vadd.xlane.f32.xlu1 %v3560_v41  ;;  %1770 = vadd.xlane.f32.xlu0 %v3562_v13  ;;  %v3566_v62 = vpop.eup %2639 }
 0x26d   : > { %3821 = vst [vmem:[#allocation21_spill] sm:$0xff] %v3566_v62 }
 0x26e   : > { %v3569_v44 = vpop.eup %2641 }
 0x26f   : > { %3822 = vst [vmem:[#allocation22_spill] sm:$0xff] %v3569_v44 }
 0x270   : > { %1385 = vadd.xlane.f32.xlu1 %v3566_v62 }
 0x274   : > { %1772 = vadd.xlane.f32.xlu1 %v3569_v44 }
 0x27c   : > { %v583_v9 = vpop.xlane.xlu0 %582 }
 0x27d   : > { %2643 = vrcp.f32 %v583_v9 }
 0x280   : > { %v969_v16 = vpop.xlane.xlu0 %968 }
 0x281   : > { %2645 = vrcp.f32 %v969_v16 }
 0x284   : > { %v587_v46 = vpop.xlane.xlu0 %586 }
 0x285   : > { %v585_v58 = vpop.xlane.xlu1 %584  ;;  %2647 = vrcp.f32 %v587_v46 }
 0x286   : > { %2649 = vrcp.f32 %v585_v58 }
 0x287   : > { %v2644_v36 = vpop.eup %2643 }
 0x288   : > { %v630_v30 = vmul.f32 %v2644_v36, %v3323_v57  ;;  %v973_v41 = vpop.xlane.xlu0 %972 }
 0x289   : > { %v971_v13 = vpop.xlane.xlu1 %970 }
 0x28a   : > { %646 = vst [vmem:[%s3574_s17] sm:$0xff] %v630_v30  ;;  %2651 = vrcp.f32 %v971_v13 }
 0x28b   : > { %v2646_v9 = vpop.eup %2645  ;;  %2653 = vrcp.f32 %v973_v41 }
 0x28c   : > { %v1016_v16 = vmul.f32 %v2646_v9, %v3328_v29  ;;  %v591_v46 = vpop.xlane.xlu0 %590 }
 0x28d   : > { %v589_v44 = vpop.xlane.xlu1 %588 }
 0x28e   : > { %2009 = vst [vmem:[%s3574_s17 + $0x80] sm:$0xff] %v1016_v16  ;;  %2655 = vrcp.f32 %v589_v44 }
 0x28f   : > { %v2648_v58 = vpop.eup %2647  ;;  %2657 = vrcp.f32 %v591_v46 }
 0x290   : > { %v2650_v57 = vpop.eup %2649  ;;  %v632_v36 = vmul.f32 %v2648_v58, %v3333_v54  ;;  %v977_v13 = vpop.xlane.xlu0 %976 }
 0x291   : > { %v631_v62 = vmul.f32 %v2650_v57, %v3335_v21  ;;  %v975_v30 = vpop.xlane.xlu1 %974 }
 0x292   : > { %648 = vst [vmem:[%s3574_s17 + $0x10] sm:$0xff] %v632_v36  ;;  %2659 = vrcp.f32 %v975_v30 }
 0x293   : > { %647 = vst [vmem:[%s3574_s17 + $0x8] sm:$0xff] %v631_v62  ;;  %2661 = vrcp.f32 %v977_v13 }
 0x294   : > { %v2652_v29 = vpop.eup %2651 }
 0x295   : > { %v2654_v41 = vpop.eup %2653  ;;  %v1017_v44 = vmul.f32 %v2652_v29, %v3341_v47  ;;  %v593_v9 = vpop.xlane.xlu1 %592 }
 0x296   : > { %v595_v16 = vpop.xlane.xlu0 %594  ;;  %v1018_v46 = vmul.f32 %v2654_v41, %v3343_v0  ;;  %2663 = vrcp.f32 %v593_v9 }
 0x297   : > { %2010 = vst [vmem:[%s3574_s17 + $0x88] sm:$0xff] %v1017_v44  ;;  %2665 = vrcp.f32 %v595_v16 }
 0x298   : > { %v2656_v54 = vpop.eup %2655  ;;  %2011 = vst [vmem:[%s3574_s17 + $0x90] sm:$0xff] %v1018_v46 }
 0x299   : > { %v2658_v21 = vpop.eup %2657  ;;  %v633_v62 = vmul.f32 %v2656_v54, %v3349_v55  ;;  %v979_v58 = vpop.xlane.xlu1 %978 }
 0x29a   : > { %v981_v57 = vpop.xlane.xlu0 %980  ;;  %v634_v36 = vmul.f32 %v2658_v21, %v3351_v48  ;;  %2667 = vrcp.f32 %v979_v58 }
 0x29b   : > { %649 = vst [vmem:[%s3574_s17 + $0x18] sm:$0xff] %v633_v62  ;;  %2669 = vrcp.f32 %v981_v57 }
 0x29c   : > { %v2660_v47 = vpop.eup %2659  ;;  %650 = vst [vmem:[%s3574_s17 + $0x20] sm:$0xff] %v634_v36 }
 0x29d   : > { %v2662_v0 = vpop.eup %2661  ;;  %v1019_v30 = vmul.f32 %v2660_v47, %v3357_v59  ;;  %v597_v13 = vpop.xlane.xlu1 %596 }
 0x29e   : > { %v599_v29 = vpop.xlane.xlu0 %598  ;;  %v1020_v41 = vmul.f32 %v2662_v0, %v3359_v18  ;;  %2671 = vrcp.f32 %v597_v13 }
 0x29f   : > { %2012 = vst [vmem:[%s3574_s17 + $0x98] sm:$0xff] %v1019_v30  ;;  %2673 = vrcp.f32 %v599_v29 }
 0x2a0   : > { %v2664_v55 = vpop.eup %2663  ;;  %2013 = vst [vmem:[%s3574_s17 + $0xa0] sm:$0xff] %v1020_v41 }
 0x2a1   : > { %v2666_v48 = vpop.eup %2665  ;;  %v635_v44 = vmul.f32 %v2664_v55, %v3365_v3  ;;  %v983_v9 = vpop.xlane.xlu1 %982 }
 0x2a2   : > { %v985_v16 = vpop.xlane.xlu0 %984  ;;  %v636_v46 = vmul.f32 %v2666_v48, %v3367_v19  ;;  %2675 = vrcp.f32 %v983_v9 }
 0x2a3   : > { %651 = vst [vmem:[%s3574_s17 + $0x28] sm:$0xff] %v635_v44  ;;  %2677 = vrcp.f32 %v985_v16 }
 0x2a4   : > { %v2668_v59 = vpop.eup %2667  ;;  %652 = vst [vmem:[%s3574_s17 + $0x30] sm:$0xff] %v636_v46 }
 0x2a5   : > { %v2670_v18 = vpop.eup %2669  ;;  %v1021_v54 = vmul.f32 %v2668_v59, %v3373_v7  ;;  %v601_v21 = vpop.xlane.xlu1 %600 }
 0x2a6   : > { %v603_v62 = vpop.xlane.xlu0 %602  ;;  %v1022_v58 = vmul.f32 %v2670_v18, %v3375_v31  ;;  %2679 = vrcp.f32 %v601_v21 }
 0x2a7   : > { %2014 = vst [vmem:[%s3574_s17 + $0xa8] sm:$0xff] %v1021_v54  ;;  %2681 = vrcp.f32 %v603_v62 }
 0x2a8   : > { %v2672_v3 = vpop.eup %2671  ;;  %2015 = vst [vmem:[%s3574_s17 + $0xb0] sm:$0xff] %v1022_v58 }
 0x2a9   : > { %v2674_v19 = vpop.eup %2673  ;;  %v637_v57 = vmul.f32 %v2672_v3, %v3381_v15  ;;  %v987_v36 = vpop.xlane.xlu1 %986 }
 0x2aa   : > { %v989_v47 = vpop.xlane.xlu0 %988  ;;  %v638_v0 = vmul.f32 %v2674_v19, %v3383_v35  ;;  %2683 = vrcp.f32 %v987_v36 }
 0x2ab   : > { %653 = vst [vmem:[%s3574_s17 + $0x38] sm:$0xff] %v637_v57  ;;  %2685 = vrcp.f32 %v989_v47 }
 0x2ac   : > { %v2676_v7 = vpop.eup %2675  ;;  %654 = vst [vmem:[%s3574_s17 + $0x40] sm:$0xff] %v638_v0 }
 0x2ad   : > { %v2678_v31 = vpop.eup %2677  ;;  %v1023_v30 = vmul.f32 %v2676_v7, %v3389_v20  ;;  %v605_v13 = vpop.xlane.xlu1 %604 }
 0x2ae   : > { %v607_v29 = vpop.xlane.xlu0 %606  ;;  %v1024_v41 = vmul.f32 %v2678_v31, %v3391_v2  ;;  %2687 = vrcp.f32 %v605_v13 }
 0x2af   : > { %2016 = vst [vmem:[%s3574_s17 + $0xb8] sm:$0xff] %v1023_v30  ;;  %2689 = vrcp.f32 %v607_v29 }
 0x2b0   : > { %v2680_v15 = vpop.eup %2679  ;;  %2017 = vst [vmem:[%s3574_s17 + $0xc0] sm:$0xff] %v1024_v41 }
 0x2b1   : > { %v2682_v35 = vpop.eup %2681  ;;  %v639_v55 = vmul.f32 %v2680_v15, %v3397_v32  ;;  %v991_v48 = vpop.xlane.xlu1 %990 }
 0x2b2   : > { %v993_v44 = vpop.xlane.xlu0 %992  ;;  %v640_v9 = vmul.f32 %v2682_v35, %v3399_v12  ;;  %2691 = vrcp.f32 %v991_v48 }
 0x2b3   : > { %655 = vst [vmem:[%s3574_s17 + $0x48] sm:$0xff] %v639_v55  ;;  %2693 = vrcp.f32 %v993_v44 }
 0x2b4   : > { %v2684_v20 = vpop.eup %2683  ;;  %656 = vst [vmem:[%s3574_s17 + $0x50] sm:$0xff] %v640_v9 }
 0x2b5   : > { %v2686_v2 = vpop.eup %2685  ;;  %v1025_v16 = vmul.f32 %v2684_v20, %v3405_v38  ;;  %v609_v46 = vpop.xlane.xlu1 %608 }
 0x2b6   : > { %v611_v59 = vpop.xlane.xlu0 %610  ;;  %v1026_v18 = vmul.f32 %v2686_v2, %v3407_v37  ;;  %2695 = vrcp.f32 %v609_v46 }
 0x2b7   : > { %2018 = vst [vmem:[%s3574_s17 + $0xc8] sm:$0xff] %v1025_v16  ;;  %2697 = vrcp.f32 %v611_v59 }
 0x2b8   : > { %v2688_v32 = vpop.eup %2687  ;;  %2019 = vst [vmem:[%s3574_s17 + $0xd0] sm:$0xff] %v1026_v18 }
 0x2b9   : > { %v2690_v12 = vpop.eup %2689  ;;  %v641_v54 = vmul.f32 %v2688_v32, %v3413_v50  ;;  %v995_v21 = vpop.xlane.xlu1 %994 }
 0x2ba   : > { %v997_v62 = vpop.xlane.xlu0 %996  ;;  %v642_v58 = vmul.f32 %v2690_v12, %v3415_v39  ;;  %2699 = vrcp.f32 %v995_v21 }
 0x2bb   : > { %657 = vst [vmem:[%s3574_s17 + $0x58] sm:$0xff] %v641_v54  ;;  %2701 = vrcp.f32 %v997_v62 }
 0x2bc   : > { %v2692_v38 = vpop.eup %2691  ;;  %658 = vst [vmem:[%s3574_s17 + $0x60] sm:$0xff] %v642_v58 }
 0x2bd   : > { %v2694_v37 = vpop.eup %2693  ;;  %v1027_v3 = vmul.f32 %v2692_v38, %v3421_v56  ;;  %v613_v19 = vpop.xlane.xlu1 %612 }
 0x2be   : > { %v1356_v57 = vpop.xlane.xlu0 %1355  ;;  %v1028_v36 = vmul.f32 %v2694_v37, %v3423_v45  ;;  %2703 = vrcp.f32 %v613_v19 }
 0x2bf   : > { %2020 = vst [vmem:[%s3574_s17 + $0xd8] sm:$0xff] %v1027_v3  ;;  %2705 = vrcp.f32 %v1356_v57 }
 0x2c0   : > { %v2696_v50 = vpop.eup %2695  ;;  %2021 = vst [vmem:[%s3574_s17 + $0xe0] sm:$0xff] %v1028_v36 }
 0x2c1   : > { %v2698_v39 = vpop.eup %2697  ;;  %v643_v47 = vmul.f32 %v2696_v50, %v3429_v4  ;;  %v999_v0 = vpop.xlane.xlu1 %998 }
 0x2c2   : > { %v1743_v7 = vpop.xlane.xlu0 %1742  ;;  %v644_v31 = vmul.f32 %v2698_v39, %v3431_v25  ;;  %2707 = vrcp.f32 %v999_v0 }
 0x2c3   : > { %659 = vst [vmem:[%s3574_s17 + $0x68] sm:$0xff] %v643_v47  ;;  %2709 = vrcp.f32 %v1743_v7 }
 0x2c4   : > { %v2700_v56 = vpop.eup %2699  ;;  %660 = vst [vmem:[%s3574_s17 + $0x70] sm:$0xff] %v644_v31 }
 0x2c5   : > { %v2702_v45 = vpop.eup %2701  ;;  %v1029_v30 = vmul.f32 %v2700_v56, %v3437_v10  ;;  %v1358_v13 = vpop.xlane.xlu1 %1357 }
 0x2c6   : > { %v1360_v29 = vpop.xlane.xlu0 %1359  ;;  %v1030_v41 = vmul.f32 %v2702_v45, %v3439_v6  ;;  %2711 = vrcp.f32 %v1358_v13  ;;  %v3823_v45 = vld [vmem:[#allocation13_spill] sm:$0xff] }
 0x2c7   : > { %2022 = vst [vmem:[%s3574_s17 + $0xe8] sm:$0xff] %v1029_v30  ;;  %2713 = vrcp.f32 %v1360_v29 }
 0x2c8   : > { %v2704_v4 = vpop.eup %2703  ;;  %2023 = vst [vmem:[%s3574_s17 + $0xf0] sm:$0xff] %v1030_v41 }
 0x2c9   : > { %v2706_v25 = vpop.eup %2705  ;;  %v645_v15 = vmul.f32 %v2704_v4, %v3445_v24  ;;  %v1745_v35 = vpop.xlane.xlu1 %1744  ;;  %v3824_v4 = vld [vmem:[#allocation15_spill] sm:$0xff] }
 0x2ca   : > { %v1747_v55 = vpop.xlane.xlu0 %1746  ;;  %v1403_v48 = vmul.f32 %v2706_v25, %v3447_v34  ;;  %2715 = vrcp.f32 %v1745_v35  ;;  %v3825_v35 = vld [vmem:[#allocation14_spill] sm:$0xff] }
 0x2cb   : > { %661 = vst [vmem:[%s3574_s17 + $0x78] sm:$0xff] %v645_v15  ;;  %2717 = vrcp.f32 %v1747_v55 }
 0x2cc   : > { %v2708_v10 = vpop.eup %2707  ;;  %2041 = vst [vmem:[%s3574_s17 + $0x100] sm:$0xff] %v1403_v48 }
 0x2cd   : > { %v2710_v6 = vpop.eup %2709  ;;  %v1031_v44 = vmul.f32 %v2708_v10, %v3453_v33  ;;  %v1362_v9 = vpop.xlane.xlu1 %1361 }
 0x2ce   : > { %v1364_v20 = vpop.xlane.xlu0 %1363  ;;  %v1790_v2 = vmul.f32 %v2710_v6, %v3455_v27  ;;  %2719 = vrcp.f32 %v1362_v9  ;;  %v3826_v6 = vld [vmem:[#allocation16_spill] sm:$0xff] }
 0x2cf   : > { %2024 = vst [vmem:[%s3574_s17 + $0xf8] sm:$0xff] %v1031_v44  ;;  %2721 = vrcp.f32 %v1364_v20 }
 0x2d0   : > { %v2712_v24 = vpop.eup %2711  ;;  %2073 = vst [vmem:[%s3574_s17 + $0x180] sm:$0xff] %v1790_v2 }
 0x2d1   : > { %v2714_v34 = vpop.eup %2713  ;;  %v1404_v16 = vmul.f32 %v2712_v24, %v3461_v52  ;;  %v1749_v46 = vpop.xlane.xlu1 %1748 }
 0x2d2   : > { %v1751_v59 = vpop.xlane.xlu0 %1750  ;;  %v1405_v18 = vmul.f32 %v2714_v34, %v3463_v17  ;;  %2723 = vrcp.f32 %v1749_v46 }
 0x2d3   : > { %2042 = vst [vmem:[%s3574_s17 + $0x108] sm:$0xff] %v1404_v16  ;;  %2725 = vrcp.f32 %v1751_v59  ;;  %v3827_v59 = vld [vmem:[#allocation17_spill] sm:$0xff] }
 0x2d4   : > { %v2716_v33 = vpop.eup %2715  ;;  %2043 = vst [vmem:[%s3574_s17 + $0x110] sm:$0xff] %v1405_v18 }
 0x2d5   : > { %v2718_v27 = vpop.eup %2717  ;;  %v1791_v32 = vmul.f32 %v2716_v33, %v3469_v60  ;;  %v1366_v12 = vpop.xlane.xlu1 %1365 }
 0x2d6   : > { %v1368_v54 = vpop.xlane.xlu0 %1367  ;;  %v1792_v21 = vmul.f32 %v2718_v27, %v3471_v43  ;;  %2727 = vrcp.f32 %v1366_v12 }
 0x2d7   : > { %2074 = vst [vmem:[%s3574_s17 + $0x188] sm:$0xff] %v1791_v32  ;;  %2729 = vrcp.f32 %v1368_v54  ;;  %v3828_v32 = vld [vmem:[#allocation19_spill] sm:$0xff] }
 0x2d8   : > { %v2720_v52 = vpop.eup %2719  ;;  %2075 = vst [vmem:[%s3574_s17 + $0x190] sm:$0xff] %v1792_v21 }
 0x2d9   : > { %v2722_v17 = vpop.eup %2721  ;;  %v1406_v62 = vmul.f32 %v2720_v52, %v3477_v14  ;;  %v1753_v58 = vpop.xlane.xlu1 %1752 }
 0x2da   : > { %v1755_v38 = vpop.xlane.xlu0 %1754  ;;  %v1407_v37 = vmul.f32 %v2722_v17, %v3479_v22  ;;  %2731 = vrcp.f32 %v1753_v58 }
 0x2db   : > { %2044 = vst [vmem:[%s3574_s17 + $0x118] sm:$0xff] %v1406_v62  ;;  %2733 = vrcp.f32 %v1755_v38 }
 0x2dc   : > { %v2724_v60 = vpop.eup %2723  ;;  %2045 = vst [vmem:[%s3574_s17 + $0x120] sm:$0xff] %v1407_v37 }
 0x2dd   : > { %v2726_v43 = vpop.eup %2725  ;;  %v1793_v3 = vmul.f32 %v2724_v60, %v3485_v28  ;;  %v1370_v19 = vpop.xlane.xlu1 %1369 }
 0x2de   : > { %v1372_v57 = vpop.xlane.xlu0 %1371  ;;  %v1794_v36 = vmul.f32 %v2726_v43, %v3487_v42  ;;  %2735 = vrcp.f32 %v1370_v19 }
 0x2df   : > { %2076 = vst [vmem:[%s3574_s17 + $0x198] sm:$0xff] %v1793_v3  ;;  %2737 = vrcp.f32 %v1372_v57  ;;  %v3829_v57 = vld [vmem:[#allocation18_spill] sm:$0xff] }
 0x2e0   : > { %v2728_v14 = vpop.eup %2727  ;;  %2077 = vst [vmem:[%s3574_s17 + $0x1a0] sm:$0xff] %v1794_v36 }
 0x2e1   : > { %v2730_v22 = vpop.eup %2729  ;;  %v1408_v50 = vmul.f32 %v2728_v14, %v3493_v23  ;;  %v1757_v39 = vpop.xlane.xlu1 %1756  ;;  %v3830_v14 = vld [vmem:[#allocation20_spill] sm:$0xff] }
 0x2e2   : > { %v1759_v47 = vpop.xlane.xlu0 %1758  ;;  %v1409_v0 = vmul.f32 %v2730_v22, %v3495_v63  ;;  %2739 = vrcp.f32 %v1757_v39  ;;  %v3831_v39 = vld [vmem:[#allocation21_spill] sm:$0xff] }
 0x2e3   : > { %2046 = vst [vmem:[%s3574_s17 + $0x128] sm:$0xff] %v1408_v50  ;;  %2741 = vrcp.f32 %v1759_v47 }
 0x2e4   : > { %v2732_v28 = vpop.eup %2731  ;;  %2047 = vst [vmem:[%s3574_s17 + $0x130] sm:$0xff] %v1409_v0  ;;  %v3832_v0 = vld [vmem:[#allocation22_spill] sm:$0xff] }
 0x2e5   : > { %v2734_v42 = vpop.eup %2733  ;;  %v1795_v7 = vmul.f32 %v2732_v28, %v3501_v51  ;;  %v1374_v31 = vpop.xlane.xlu1 %1373 }
 0x2e6   : > { %v1376_v56 = vpop.xlane.xlu0 %1375  ;;  %v1796_v30 = vmul.f32 %v2734_v42, %v3823_v45  ;;  %2743 = vrcp.f32 %v1374_v31 }
 0x2e7   : > { %2078 = vst [vmem:[%s3574_s17 + $0x1a8] sm:$0xff] %v1795_v7  ;;  %2745 = vrcp.f32 %v1376_v56 }
 0x2e8   : > { %v2736_v23 = vpop.eup %2735  ;;  %2079 = vst [vmem:[%s3574_s17 + $0x1b0] sm:$0xff] %v1796_v30 }
 0x2e9   : > { %v2738_v63 = vpop.eup %2737  ;;  %v1410_v13 = vmul.f32 %v2736_v23, %v3509_v1  ;;  %v1761_v29 = vpop.xlane.xlu1 %1760 }
 0x2ea   : > { %v1763_v41 = vpop.xlane.xlu0 %1762  ;;  %v1411_v25 = vmul.f32 %v2738_v63, %v3824_v4  ;;  %2747 = vrcp.f32 %v1761_v29 }
 0x2eb   : > { %2048 = vst [vmem:[%s3574_s17 + $0x138] sm:$0xff] %v1410_v13  ;;  %2749 = vrcp.f32 %v1763_v41 }
 0x2ec   : > { %v2740_v51 = vpop.eup %2739  ;;  %2049 = vst [vmem:[%s3574_s17 + $0x140] sm:$0xff] %v1411_v25 }
 0x2ed   : > { %v2742_v15 = vpop.eup %2741  ;;  %v1797_v55 = vmul.f32 %v2740_v51, %v3825_v35  ;;  %v1378_v48 = vpop.xlane.xlu1 %1377 }
 0x2ee   : > { %v1380_v10 = vpop.xlane.xlu0 %1379  ;;  %v1798_v44 = vmul.f32 %v2742_v15, %v3826_v6  ;;  %2751 = vrcp.f32 %v1378_v48 }
 0x2ef   : > { %2080 = vst [vmem:[%s3574_s17 + $0x1b8] sm:$0xff] %v1797_v55  ;;  %2753 = vrcp.f32 %v1380_v10 }
 0x2f0   : > { %v2744_v1 = vpop.eup %2743  ;;  %2081 = vst [vmem:[%s3574_s17 + $0x1c0] sm:$0xff] %v1798_v44 }
 0x2f1   : > { %v2746_v9 = vpop.eup %2745  ;;  %v1412_v20 = vmul.f32 %v2744_v1, %v3525_v26  ;;  %v1765_v2 = vpop.xlane.xlu1 %1764 }
 0x2f2   : > { %v1767_v24 = vpop.xlane.xlu0 %1766  ;;  %v1413_v34 = vmul.f32 %v2746_v9, %v3527_v5  ;;  %2755 = vrcp.f32 %v1765_v2 }
 0x2f3   : > { %2050 = vst [vmem:[%s3574_s17 + $0x148] sm:$0xff] %v1412_v20  ;;  %2757 = vrcp.f32 %v1767_v24 }
 0x2f4   : > { %v2748_v16 = vpop.eup %2747  ;;  %2051 = vst [vmem:[%s3574_s17 + $0x150] sm:$0xff] %v1413_v34 }
 0x2f5   : > { %v2750_v46 = vpop.eup %2749  ;;  %v1799_v18 = vmul.f32 %v2748_v16, %v3827_v59  ;;  %v1382_v33 = vpop.xlane.xlu1 %1381 }
 0x2f6   : > { %v1384_v27 = vpop.xlane.xlu0 %1383  ;;  %v1800_v12 = vmul.f32 %v2750_v46, %v3828_v32  ;;  %2759 = vrcp.f32 %v1382_v33 }
 0x2f7   : > { %2082 = vst [vmem:[%s3574_s17 + $0x1c8] sm:$0xff] %v1799_v18  ;;  %2761 = vrcp.f32 %v1384_v27 }
 0x2f8   : > { %v2752_v26 = vpop.eup %2751  ;;  %2083 = vst [vmem:[%s3574_s17 + $0x1d0] sm:$0xff] %v1800_v12 }
 0x2f9   : > { %v2754_v5 = vpop.eup %2753  ;;  %v1414_v54 = vmul.f32 %v2752_v26, %v3541_v8  ;;  %v1769_v21 = vpop.xlane.xlu1 %1768 }
 0x2fa   : > { %v1771_v52 = vpop.xlane.xlu0 %1770  ;;  %v1415_v17 = vmul.f32 %v2754_v5, %v3543_v53  ;;  %2763 = vrcp.f32 %v1769_v21 }
 0x2fb   : > { %2052 = vst [vmem:[%s3574_s17 + $0x158] sm:$0xff] %v1414_v54  ;;  %2765 = vrcp.f32 %v1771_v52 }
 0x2fc   : > { %v2756_v62 = vpop.eup %2755  ;;  %2053 = vst [vmem:[%s3574_s17 + $0x160] sm:$0xff] %v1415_v17 }
 0x2fd   : > { %v2758_v58 = vpop.eup %2757  ;;  %v1801_v38 = vmul.f32 %v2756_v62, %v3548_v40  ;;  %v1386_v37 = vpop.xlane.xlu1 %1385 }
 0x2fe   : > { %v1802_v60 = vmul.f32 %v2758_v58, %v3550_v61  ;;  %2767 = vrcp.f32 %v1386_v37 }
 0x2ff   : > { %2084 = vst [vmem:[%s3574_s17 + $0x1d8] sm:$0xff] %v1801_v38 }
 0x300   : > { %v2760_v8 = vpop.eup %2759  ;;  %2085 = vst [vmem:[%s3574_s17 + $0x1e0] sm:$0xff] %v1802_v60 }
 0x301   : > { %v2762_v53 = vpop.eup %2761  ;;  %v1416_v43 = vmul.f32 %v2760_v8, %v3554_v49  ;;  %v1773_v3 = vpop.xlane.xlu1 %1772 }
 0x302   : > { %v1417_v19 = vmul.f32 %v2762_v53, %v3556_v11  ;;  %2769 = vrcp.f32 %v1773_v3 }
 0x303   : > { %2054 = vst [vmem:[%s3574_s17 + $0x168] sm:$0xff] %v1416_v43 }
 0x304   : > { %v2764_v40 = vpop.eup %2763  ;;  %2055 = vst [vmem:[%s3574_s17 + $0x170] sm:$0xff] %v1417_v19 }
 0x305   : > { %v2766_v61 = vpop.eup %2765  ;;  %v1803_v36 = vmul.f32 %v2764_v40, %v3829_v57 }
 0x306   : > { %v1804_v22 = vmul.f32 %v2766_v61, %v3830_v14 }
 0x307   : > { %2086 = vst [vmem:[%s3574_s17 + $0x1e8] sm:$0xff] %v1803_v36 }
 0x308   : > { %v2768_v50 = vpop.eup %2767  ;;  %2087 = vst [vmem:[%s3574_s17 + $0x1f0] sm:$0xff] %v1804_v22 }
 0x309   : > { %v1418_v47 = vmul.f32 %v2768_v50, %v3831_v39 }
 0x30b   : > { %2056 = vst [vmem:[%s3574_s17 + $0x178] sm:$0xff] %v1418_v47 }
 0x30c   : > { %v2770_v49 = vpop.eup %2769 }
 0x30d   : > { %v1805_v28 = vmul.f32 %v2770_v49, %v3832_v0 }
 0x30f   : > { %2088 = vst [vmem:[%s3574_s17 + $0x1f8] sm:$0xff] %v1805_v28 }
 0x310   : > { %s2096_s22 = sshll.u32 %s2922_s13, 11  ;;  %s1853_s23 = sshll.u32 %s3574_s17, 4  ;;  %s1854_s23 = int_to_ptr.vmem [resolvable:$true] %s1853_s23 }
 0x311   : > { %s1836_s5 = scalar_lea.hbm %s3743_s2, %s2096_s22  ;;  %s2879_s6 = smov 2048  }
 0x312   : > { %2359 = sst [smem:[#allocation9]] (%p2992_p12), %s2879_s6  ;;  %s2880_s7 = smov 4096  }
 0x313   : > { %2360 = sst [smem:[#allocation9 + $0x1]] (%p2992_p12), %s2880_s7  ;;  %s2881_s18 = smov 16  }
 0x314   : > { %2361 = sst [smem:[#allocation9 + $0x2]] (%p2992_p12), %s2881_s18  ;;  %s2882_s24 = smov 128  }
 0x315   : > { %2362 = sst [smem:[#allocation9 + $0x3]] (%p2992_p12), %s2882_s24  ;;  %s2883_s13 = smov 8  }
 0x316   : > { %2363 = sst [smem:[#allocation9 + $0x4]] (%p2992_p12), %s2882_s24  ;;  %s2884_s25 = smov [#allocation8]  }
 0x317   : > { %2364 = sst [smem:[#allocation9 + $0x5]] (%p2992_p12), %s2883_s13  ;;  %s2885_s20 = smov 0  }
 0x318   : > { %2365 = dma.general (%p2992_p12), %s1854_s23, 8192, %s1836_s5, %s1824_s27, %s2884_s25, [#allocation9], %s2885_s20, 0  }
 0x319 PF: > { %s1881_s26 = sand.u32 1, %s2859_s9   ;;  %p3833_p4 = scmp.ne.s32.totalorder %s3773_s16, 0 }
 0x31a   : > { %p3834_p6 = scmp.ge.s32.totalorder %s2871_s12, 2  ;;  %s1882_s19 = scalar_lea.sflag [#allocation4], %s1881_s26 }
 0x31c   : > { %p2376_p8 = pnand %p3834_p6, %p3833_p4 }
 0x31e   : > { %2854 = dma.done.wait (!%p2376_p8), %s1882_s19, 8192  }
 0x31f   : > { %2856 = vsyncadd (!%p2376_p8), %s1882_s19, 4294959104  ;;  %p16_p10 = scmp.ge.s32.totalorder %s2957_s21, 4   ;;  %s3835_s9 = smov %s2863_s10 }
 0x320   : > { %s3836_s10 = smov %s2867_s11  ;;  %s3837_s11 = smov %s2988_s8 }
 0x321   : > { %s3838_s12 = smov %s2957_s21  ;;  %18 = sbr.rel (!%p16_p10) target bundleno = 6 (0x6), region = 88 }
 0x328   :  { %1887 = vsyncpa [#allocation3], 1 }
 0x329   :  { %1889 = vsyncpa [#allocation3 + $0x1], 1 }
 0x32a   :  { %1890 = vsyncpa [#allocation6], 1 }
 0x32b   :  { %1891 = vsyncpa [#allocation4], 1 }
 0x32c   :  { %1893 = vsyncpa [#allocation4 + $0x1], 1 }

</bundles_post_ra>
